<compile_context>
chip_gen: v7x
topology: tpu7x:2x2x1
jax: 0.10.0
libtpu: 0.0.40
codegen_flags: <defaults>
</compile_context>

<pallas_src>
import jax
import jax.numpy as jnp
import numpy as np
from jax.experimental import pallas as pl
from jax.experimental.pallas import tpu as pltpu

B, C_IN, H, W = 2, 1, 28, 28      # classifier requires 28x28 spatial, 1 input ch
HID = 32                          # hidden channels per gate
KH = KW = 3
KK = 16                           # 3x3 taps (=9) zero-padded to 16 for clean tiling
HP = H + 2                        # 30: zero-padded image rows/cols
P = H * W                         # 784 true spatial positions (c*784 flatten order)
Q = 896                           # 7*128 lane-aligned padded position axis (r*30+col)
XLEN = 1024                       # padded flattened-image length (8 vregs)
N_CLASSES = 10
FLAT = HID * P                    # 25088
NG = 3 * HID                      # i, g, o gate rows (forget gate dropped)
JD = HID * N_CLASSES              # 320 = (channel, class) pairs of the classifier fold

# Tap k = kh*3+kw reads flattened-padded-image position q + kh*30 + kw.
OFFSETS = tuple(kh * HP + kw for kh in range(KH) for kw in range(KW))


# ----------------------------------------------------------------------------
# Fused kernel: in-kernel im2col + gate matmul + LSTM update + classifier.
# ----------------------------------------------------------------------------
def fused_lstm_kernel(x_ref, wg_ref, bg_ref, wc_ref, mask_ref, sel_ref, bc_ref,
                      out_ref, taps_ref):
    # In-kernel im2col: 9 statically-shifted (1, Q) windows of the zero-padded,
    # row-major flattened 30x30 image.  The 30-column stride means every
    # out-of-image tap hits the zero halo -> no boundary masks needed.
    taps_ref[...] = jnp.zeros_like(taps_ref)          # rows 9..15 stay zero (K pad)
    for k, off in enumerate(OFFSETS):                  # static 9-iteration loop
        taps_ref[pl.ds(k, 1), :] = x_ref[0, :, pl.ds(off, Q)]
    taps = taps_ref[...].astype(jnp.bfloat16)          # (16, 896)

    # Gate pre-activations with gates on sublanes: z[g*32+oc, q] -> (96, 896).
    z = jnp.dot(wg_ref[...], taps,
                preferred_element_type=jnp.float32) + bg_ref[...]
    i = jax.nn.sigmoid(z[0 * HID:1 * HID, :])          # lane-dense (32, 896) slices
    g = jnp.tanh(z[1 * HID:2 * HID, :])
    o = jax.nn.sigmoid(z[2 * HID:3 * HID, :])
    h_t = o * jnp.tanh(i * g)                          # (32, 896) ; c_prev == 0

    # Classifier: contract the position axis on the MXU, then fold the
    # (channel, class) block diagonal with a mask + tiny selection matmul.
    # Garbage positions (padding cols / rows, q >= 840) have zero wc rows.
    a = jnp.dot(h_t.astype(jnp.bfloat16), wc_ref[...],
                preferred_element_type=jnp.float32)            # (32, 320)
    t = jnp.dot(a * mask_ref[...], sel_ref[...],
                preferred_element_type=jnp.float32)            # (32, 10)
    out_ref[0] = jnp.sum(t, axis=0, keepdims=True) + bc_ref[...]   # (1, 10)


def fused_forward(xflat, packed):
    return pl.pallas_call(
        fused_lstm_kernel,
        out_shape=jax.ShapeDtypeStruct((B, 1, N_CLASSES), jnp.float32),
        grid_spec=pltpu.PrefetchScalarGridSpec(
            num_scalar_prefetch=0,
            grid=(B,),
            in_specs=[
                pl.BlockSpec((1, 1, XLEN), lambda b: (b, 0, 0)),  # padded image (per batch)
                pl.BlockSpec((NG, KK), lambda b: (0, 0)),         # gate weights (resident)
                pl.BlockSpec((NG, 1), lambda b: (0, 0)),          # gate biases
                pl.BlockSpec((Q, JD), lambda b: (0, 0)),          # classifier weight (resident)
                pl.BlockSpec((HID, JD), lambda b: (0, 0)),        # block-diagonal mask
                pl.BlockSpec((JD, N_CLASSES), lambda b: (0, 0)),  # class-selection matrix
                pl.BlockSpec((1, N_CLASSES), lambda b: (0, 0)),   # classifier bias
            ],
            out_specs=pl.BlockSpec((1, 1, N_CLASSES), lambda b: (b, 0, 0)),
            scratch_shapes=[pltpu.VMEM((KK, Q), jnp.float32)],    # im2col tap buffer
        ),
        compiler_params=pltpu.CompilerParams(
            dimension_semantics=("parallel",)),   # one batch per TensorCore on v7x
    )(xflat, packed["wg"], packed["bg"], packed["wc"], packed["mask"],
      packed["sel"], packed["bc"])


# ----------------------------------------------------------------------------
# Host-side glue.
# ----------------------------------------------------------------------------
def pack_params(params):
    """One-time repack of PyTorch-layout params into kernel layouts (hoisted)."""
    rows, biases = [], []
    for name in ("i", "g", "o"):                 # forget gate dropped: c_prev == 0
        w = params[f"w_{name}"][:, 0, :, :].reshape(HID, KH * KW)  # input ch only
        rows.append(w)
        biases.append(params[f"b_{name}"])
    wg = jnp.concatenate(rows, axis=0)                                  # (96, 9)
    wg = jnp.pad(wg, ((0, 0), (0, KK - KH * KW))).astype(jnp.bfloat16)  # (96, 16)
    bg = jnp.concatenate(biases).reshape(NG, 1).astype(jnp.float32)

    # Classifier weight on the padded position axis:
    #   wc[q, c*10+n] = W[n, c*784 + r*28 + col]  for q = r*30 + col, col < 28,
    #   zero on the 30-stride padding columns and for q >= 840.
    w = params["w_cls"].reshape(N_CLASSES, HID, H, W)                   # [n, c, r, col]
    w = jnp.pad(w, ((0, 0), (0, 0), (0, 0), (0, HP - W)))               # [n, c, 28, 30]
    w = w.reshape(N_CLASSES, HID, H * HP)                               # [n, c, 840]
    w = jnp.pad(w, ((0, 0), (0, 0), (0, Q - H * HP)))                   # [n, c, 896]
    wc = w.transpose(2, 1, 0).reshape(Q, JD).astype(jnp.bfloat16)       # [q, c*10+n]
    bc = params["b_cls"].reshape(1, N_CLASSES).astype(jnp.float32)

    # mask[c', j] keeps the c' == j//10 diagonal; sel[j, n] groups j by class n.
    c_idx = np.arange(HID)
    j_idx = np.arange(JD)
    mask = (j_idx[None, :] // N_CLASSES == c_idx[:, None]).astype(np.float32)
    sel = (j_idx[:, None] % N_CLASSES ==
           np.arange(N_CLASSES)[None, :]).astype(np.float32)
    return dict(wg=wg, bg=bg, wc=wc, mask=jnp.asarray(mask),
                sel=jnp.asarray(sel), bc=bc)


@jax.jit
def my_lstm_forward(x, packed):
    # Minimal host prep (tiny fusion): zero-pad the conv halo, flatten row-major
    # with the padded 30-column stride, pad to a lane-aligned 1024 vector.
    xp = jnp.pad(x[:, 0], ((0, 0), (1, 1), (1, 1)))                 # (B, 30, 30)
    xflat = xp.reshape(B, 1, HP * HP)                               # (B, 1, 900)
    xflat = jnp.pad(xflat, ((0, 0), (0, 0), (0, XLEN - HP * HP)))   # (B, 1, 1024)
    out = fused_forward(xflat, packed)
    return out.reshape(B, N_CLASSES)


# ----------------------------------------------------------------------------
# Parameter init (PyTorch-style) and plain-JAX reference of the full module.
# ----------------------------------------------------------------------------
def init_params(key):
    params = {}
    fan_conv = (C_IN + HID) * KH * KW
    bnd_c = 1.0 / np.sqrt(fan_conv)
    for name in ("f", "i", "g", "o"):
        key, k1, k2 = jax.random.split(key, 3)
        params[f"w_{name}"] = jax.random.uniform(
            k1, (HID, C_IN + HID, KH, KW), jnp.float32, -bnd_c, bnd_c)
        params[f"b_{name}"] = jax.random.uniform(
            k2, (HID,), jnp.float32, -bnd_c, bnd_c)
    bnd_l = 1.0 / np.sqrt(FLAT)
    key, k1, k2 = jax.random.split(key, 3)
    params["w_cls"] = jax.random.uniform(
        k1, (N_CLASSES, FLAT), jnp.float32, -bnd_l, bnd_l)
    params["b_cls"] = jax.random.uniform(
        k2, (N_CLASSES,), jnp.float32, -bnd_l, bnd_l)
    return params


def reference_forward(x, params):
    """Plain-JAX reference matching the PyTorch forward (full 33-ch convs)."""
    def conv(inp, w, b):
        out = jax.lax.conv_general_dilated(
            inp, w, (1, 1), ((1, 1), (1, 1)),
            dimension_numbers=("NCHW", "OIHW", "NCHW"))
        return out + b[None, :, None, None]

    h0 = jnp.zeros((B, HID, H, W), jnp.float32)
    c0 = jnp.zeros((B, HID, H, W), jnp.float32)
    xc = jnp.concatenate([x, h0], axis=1)
    f = jax.nn.sigmoid(conv(xc, params["w_f"], params["b_f"]))
    i = jax.nn.sigmoid(conv(xc, params["w_i"], params["b_i"]))
    g = jnp.tanh(conv(xc, params["w_g"], params["b_g"]))
    o = jax.nn.sigmoid(conv(xc, params["w_o"], params["b_o"]))
    c = c0 * f + i * g
    h = o * jnp.tanh(c)
    out = h.reshape(B, FLAT)
    return out @ params["w_cls"].T + params["b_cls"]


if __name__ == "__main__":
    key = jax.random.PRNGKey(0)
    kp, kx = jax.random.split(key)
    params = init_params(kp)
    packed = pack_params(params)                     # one-time weight repack
    x = jax.random.normal(kx, (B, C_IN, H, W), jnp.float32)

    out = my_lstm_forward(x, packed)
    out = jax.block_until_ready(out)

    ref = reference_forward(x, params)
    np.testing.assert_allclose(np.asarray(out), np.asarray(ref),
                               rtol=2e-2, atol=2e-2)
    assert out.shape == (B, N_CLASSES)
    print("KERNEL_OK")
</pallas_src>

<mosaic_0001>
module attributes {stable_mosaic.version = 11 : i64} {
  func.func @fused_lstm_kernel(%arg0: i32, %arg1: memref<1x1x1024xf32, #tpu.memory_space<vmem>>, %arg2: memref<96x16xbf16, #tpu.memory_space<vmem>>, %arg3: memref<96x1xf32, #tpu.memory_space<vmem>>, %arg4: memref<896x320xbf16, #tpu.memory_space<vmem>>, %arg5: memref<32x320xf32, #tpu.memory_space<vmem>>, %arg6: memref<320x10xf32, #tpu.memory_space<vmem>>, %arg7: memref<1x10xf32, #tpu.memory_space<vmem>>, %arg8: memref<1x1x10xf32, #tpu.memory_space<vmem>>, %arg9: memref<16x896xf32, #tpu.memory_space<vmem>>) attributes {dimension_semantics = [#tpu.dimension_semantics<parallel>], iteration_bounds = array<i64: 2>, scalar_prefetch = 0 : i64, scratch_operands = 1 : i64, tpu.core_type = #tpu.core_type<tc>, window_params = [{transform_indices = @transform_0, window_bounds = array<i64: 1, 1, 1024>}, {pipeline_mode = #tpu.pipeline_mode<synchronous>, transform_indices = @transform_1, window_bounds = array<i64: 96, 16>}, {pipeline_mode = #tpu.pipeline_mode<synchronous>, transform_indices = @transform_2, window_bounds = array<i64: 96, 1>}, {pipeline_mode = #tpu.pipeline_mode<synchronous>, transform_indices = @transform_3, window_bounds = array<i64: 896, 320>}, {pipeline_mode = #tpu.pipeline_mode<synchronous>, transform_indices = @transform_4, window_bounds = array<i64: 32, 320>}, {pipeline_mode = #tpu.pipeline_mode<synchronous>, transform_indices = @transform_5, window_bounds = array<i64: 320, 10>}, {pipeline_mode = #tpu.pipeline_mode<synchronous>, transform_indices = @transform_6, window_bounds = array<i64: 1, 10>}, {transform_indices = @transform_7, window_bounds = array<i64: 1, 1, 10>}]} {
    %cst = arith.constant 0.000000e+00 : f32
    %0 = vector.broadcast %cst : f32 to vector<16x896xf32>
    %c0 = arith.constant 0 : index
    %c0_0 = arith.constant 0 : index
    %1 = vector.load %arg9[%c0, %c0_0] : memref<16x896xf32, #tpu.memory_space<vmem>>, vector<16x896xf32>
    tpu.vector_store %arg9[%c0, %c0_0], %0 {strides = array<i32>} : memref<16x896xf32, #tpu.memory_space<vmem>>, vector<16x896xf32>,
    %c0_1 = arith.constant 0 : index
    %c0_2 = arith.constant 0 : index
    %c0_3 = arith.constant 0 : index
    %2 = vector.load %arg1[%c0_1, %c0_2, %c0_3] : memref<1x1x1024xf32, #tpu.memory_space<vmem>>, vector<1x1x896xf32>
    %3 = vector.shape_cast %2 : vector<1x1x896xf32> to vector<1x896xf32>
    %c0_4 = arith.constant 0 : index
    %c0_5 = arith.constant 0 : index
    %4 = vector.load %arg9[%c0_4, %c0_5] : memref<16x896xf32, #tpu.memory_space<vmem>>, vector<1x896xf32>
    tpu.vector_store %arg9[%c0_4, %c0_5], %3 {strides = array<i32>} : memref<16x896xf32, #tpu.memory_space<vmem>>, vector<1x896xf32>,
    %c0_6 = arith.constant 0 : index
    %c0_7 = arith.constant 0 : index
    %c1 = arith.constant 1 : index
    %5 = vector.load %arg1[%c0_6, %c0_7, %c1] : memref<1x1x1024xf32, #tpu.memory_space<vmem>>, vector<1x1x896xf32>
    %6 = vector.shape_cast %5 : vector<1x1x896xf32> to vector<1x896xf32>
    %c1_8 = arith.constant 1 : index
    %c0_9 = arith.constant 0 : index
    %7 = vector.load %arg9[%c1_8, %c0_9] : memref<16x896xf32, #tpu.memory_space<vmem>>, vector<1x896xf32>
    tpu.vector_store %arg9[%c1_8, %c0_9], %6 {strides = array<i32>} : memref<16x896xf32, #tpu.memory_space<vmem>>, vector<1x896xf32>,
    %c0_10 = arith.constant 0 : index
    %c0_11 = arith.constant 0 : index
    %c2 = arith.constant 2 : index
    %8 = vector.load %arg1[%c0_10, %c0_11, %c2] : memref<1x1x1024xf32, #tpu.memory_space<vmem>>, vector<1x1x896xf32>
    %9 = vector.shape_cast %8 : vector<1x1x896xf32> to vector<1x896xf32>
    %c2_12 = arith.constant 2 : index
    %c0_13 = arith.constant 0 : index
    %10 = vector.load %arg9[%c2_12, %c0_13] : memref<16x896xf32, #tpu.memory_space<vmem>>, vector<1x896xf32>
    tpu.vector_store %arg9[%c2_12, %c0_13], %9 {strides = array<i32>} : memref<16x896xf32, #tpu.memory_space<vmem>>, vector<1x896xf32>,
    %c0_14 = arith.constant 0 : index
    %c0_15 = arith.constant 0 : index
    %c30 = arith.constant 30 : index
    %11 = vector.load %arg1[%c0_14, %c0_15, %c30] : memref<1x1x1024xf32, #tpu.memory_space<vmem>>, vector<1x1x896xf32>
    %12 = vector.shape_cast %11 : vector<1x1x896xf32> to vector<1x896xf32>
    %c3 = arith.constant 3 : index
    %c0_16 = arith.constant 0 : index
    %13 = vector.load %arg9[%c3, %c0_16] : memref<16x896xf32, #tpu.memory_space<vmem>>, vector<1x896xf32>
    tpu.vector_store %arg9[%c3, %c0_16], %12 {strides = array<i32>} : memref<16x896xf32, #tpu.memory_space<vmem>>, vector<1x896xf32>,
    %c0_17 = arith.constant 0 : index
    %c0_18 = arith.constant 0 : index
    %c31 = arith.constant 31 : index
    %14 = vector.load %arg1[%c0_17, %c0_18, %c31] : memref<1x1x1024xf32, #tpu.memory_space<vmem>>, vector<1x1x896xf32>
    %15 = vector.shape_cast %14 : vector<1x1x896xf32> to vector<1x896xf32>
    %c4 = arith.constant 4 : index
    %c0_19 = arith.constant 0 : index
    %16 = vector.load %arg9[%c4, %c0_19] : memref<16x896xf32, #tpu.memory_space<vmem>>, vector<1x896xf32>
    tpu.vector_store %arg9[%c4, %c0_19], %15 {strides = array<i32>} : memref<16x896xf32, #tpu.memory_space<vmem>>, vector<1x896xf32>,
    %c0_20 = arith.constant 0 : index
    %c0_21 = arith.constant 0 : index
    %c32 = arith.constant 32 : index
    %17 = vector.load %arg1[%c0_20, %c0_21, %c32] : memref<1x1x1024xf32, #tpu.memory_space<vmem>>, vector<1x1x896xf32>
    %18 = vector.shape_cast %17 : vector<1x1x896xf32> to vector<1x896xf32>
    %c5 = arith.constant 5 : index
    %c0_22 = arith.constant 0 : index
    %19 = vector.load %arg9[%c5, %c0_22] : memref<16x896xf32, #tpu.memory_space<vmem>>, vector<1x896xf32>
    tpu.vector_store %arg9[%c5, %c0_22], %18 {strides = array<i32>} : memref<16x896xf32, #tpu.memory_space<vmem>>, vector<1x896xf32>,
    %c0_23 = arith.constant 0 : index
    %c0_24 = arith.constant 0 : index
    %c60 = arith.constant 60 : index
    %20 = vector.load %arg1[%c0_23, %c0_24, %c60] : memref<1x1x1024xf32, #tpu.memory_space<vmem>>, vector<1x1x896xf32>
    %21 = vector.shape_cast %20 : vector<1x1x896xf32> to vector<1x896xf32>
    %c6 = arith.constant 6 : index
    %c0_25 = arith.constant 0 : index
    %22 = vector.load %arg9[%c6, %c0_25] : memref<16x896xf32, #tpu.memory_space<vmem>>, vector<1x896xf32>
    tpu.vector_store %arg9[%c6, %c0_25], %21 {strides = array<i32>} : memref<16x896xf32, #tpu.memory_space<vmem>>, vector<1x896xf32>,
    %c0_26 = arith.constant 0 : index
    %c0_27 = arith.constant 0 : index
    %c61 = arith.constant 61 : index
    %23 = vector.load %arg1[%c0_26, %c0_27, %c61] : memref<1x1x1024xf32, #tpu.memory_space<vmem>>, vector<1x1x896xf32>
    %24 = vector.shape_cast %23 : vector<1x1x896xf32> to vector<1x896xf32>
    %c7 = arith.constant 7 : index
    %c0_28 = arith.constant 0 : index
    %25 = vector.load %arg9[%c7, %c0_28] : memref<16x896xf32, #tpu.memory_space<vmem>>, vector<1x896xf32>
    tpu.vector_store %arg9[%c7, %c0_28], %24 {strides = array<i32>} : memref<16x896xf32, #tpu.memory_space<vmem>>, vector<1x896xf32>,
    %c0_29 = arith.constant 0 : index
    %c0_30 = arith.constant 0 : index
    %c62 = arith.constant 62 : index
    %26 = vector.load %arg1[%c0_29, %c0_30, %c62] : memref<1x1x1024xf32, #tpu.memory_space<vmem>>, vector<1x1x896xf32>
    %27 = vector.shape_cast %26 : vector<1x1x896xf32> to vector<1x896xf32>
    %c8 = arith.constant 8 : index
    %c0_31 = arith.constant 0 : index
    %28 = vector.load %arg9[%c8, %c0_31] : memref<16x896xf32, #tpu.memory_space<vmem>>, vector<1x896xf32>
    tpu.vector_store %arg9[%c8, %c0_31], %27 {strides = array<i32>} : memref<16x896xf32, #tpu.memory_space<vmem>>, vector<1x896xf32>,
    %c0_32 = arith.constant 0 : index
    %c0_33 = arith.constant 0 : index
    %29 = vector.load %arg9[%c0_32, %c0_33] : memref<16x896xf32, #tpu.memory_space<vmem>>, vector<16x896xf32>
    %30 = arith.truncf %29 : vector<16x896xf32> to vector<16x896xbf16>
    %c0_34 = arith.constant 0 : index
    %c0_35 = arith.constant 0 : index
    %31 = vector.load %arg2[%c0_34, %c0_35] : memref<96x16xbf16, #tpu.memory_space<vmem>>, vector<96x16xbf16>
    %cst_36 = arith.constant dense<0.000000e+00> : vector<96x896xf32>
    %32 = tpu.matmul %31, %30, %cst_36 {dimension_numbers = #tpu.dot_dimension_numbers<[1], [0], [0], [1], [0, 0, 1, 1], [], []>} : vector<96x16xbf16>, vector<16x896xbf16>, vector<96x896xf32> -> vector<96x896xf32>
    %c0_37 = arith.constant 0 : index
    %c0_38 = arith.constant 0 : index
    %33 = vector.load %arg3[%c0_37, %c0_38] : memref<96x1xf32, #tpu.memory_space<vmem>>, vector<96x1xf32>
    %34 = vector.broadcast %33 : vector<96x1xf32> to vector<96x896xf32>
    %35 = arith.addf %32, %34 : vector<96x896xf32>
    %36 = vector.extract_strided_slice %35 {offsets = [0, 0], sizes = [32, 896], strides = [1, 1]} : vector<96x896xf32> to vector<32x896xf32>
    %37 = arith.negf %36 : vector<32x896xf32>
    %38 = math.exp %37 : vector<32x896xf32>
    %cst_39 = arith.constant 1.000000e+00 : f32
    %39 = vector.broadcast %cst_39 : f32 to vector<32x896xf32>
    %40 = arith.addf %39, %38 : vector<32x896xf32>
    %41 = arith.divf %39, %40 : vector<32x896xf32>
    %42 = vector.extract_strided_slice %35 {offsets = [32, 0], sizes = [32, 896], strides = [1, 1]} : vector<96x896xf32> to vector<32x896xf32>
    %43 = math.tanh %42 : vector<32x896xf32>
    %44 = vector.extract_strided_slice %35 {offsets = [64, 0], sizes = [32, 896], strides = [1, 1]} : vector<96x896xf32> to vector<32x896xf32>
    %45 = arith.negf %44 : vector<32x896xf32>
    %46 = math.exp %45 : vector<32x896xf32>
    %cst_40 = arith.constant 1.000000e+00 : f32
    %47 = vector.broadcast %cst_40 : f32 to vector<32x896xf32>
    %48 = arith.addf %47, %46 : vector<32x896xf32>
    %49 = arith.divf %47, %48 : vector<32x896xf32>
    %50 = arith.mulf %41, %43 : vector<32x896xf32>
    %51 = math.tanh %50 : vector<32x896xf32>
    %52 = arith.mulf %49, %51 : vector<32x896xf32>
    %53 = arith.truncf %52 : vector<32x896xf32> to vector<32x896xbf16>
    %c0_41 = arith.constant 0 : index
    %c0_42 = arith.constant 0 : index
    %54 = vector.load %arg4[%c0_41, %c0_42] : memref<896x320xbf16, #tpu.memory_space<vmem>>, vector<896x320xbf16>
    %cst_43 = arith.constant dense<0.000000e+00> : vector<32x320xf32>
    %55 = tpu.matmul %53, %54, %cst_43 {dimension_numbers = #tpu.dot_dimension_numbers<[1], [0], [0], [1], [0, 0, 1, 1], [], []>} : vector<32x896xbf16>, vector<896x320xbf16>, vector<32x320xf32> -> vector<32x320xf32>
    %c0_44 = arith.constant 0 : index
    %c0_45 = arith.constant 0 : index
    %56 = vector.load %arg5[%c0_44, %c0_45] : memref<32x320xf32, #tpu.memory_space<vmem>>, vector<32x320xf32>
    %57 = arith.mulf %55, %56 : vector<32x320xf32>
    %c0_46 = arith.constant 0 : index
    %c0_47 = arith.constant 0 : index
    %58 = vector.load %arg6[%c0_46, %c0_47] : memref<320x10xf32, #tpu.memory_space<vmem>>, vector<320x10xf32>
    %cst_48 = arith.constant dense<0.000000e+00> : vector<32x10xf32>
    %59 = tpu.matmul %57, %58, %cst_48 {dimension_numbers = #tpu.dot_dimension_numbers<[1], [0], [0], [1], [0, 0, 1, 1], [], []>} : vector<32x320xf32>, vector<320x10xf32>, vector<32x10xf32> -> vector<32x10xf32>
    %cst_49 = arith.constant dense<0.000000e+00> : vector<10xf32>
    %60 = vector.multi_reduction <add>, %59, %cst_49 [0] : vector<32x10xf32> to vector<10xf32>
    %61 = vector.shape_cast %60 : vector<10xf32> to vector<1x10xf32>
    %c0_50 = arith.constant 0 : index
    %c0_51 = arith.constant 0 : index
    %62 = vector.load %arg7[%c0_50, %c0_51] : memref<1x10xf32, #tpu.memory_space<vmem>>, vector<1x10xf32>
    %63 = arith.addf %61, %62 : vector<1x10xf32>
    %c0_52 = arith.constant 0 : index
    %c0_53 = arith.constant 0 : index
    %c0_54 = arith.constant 0 : index
    %64 = vector.load %arg8[%c0_52, %c0_53, %c0_54] : memref<1x1x10xf32, #tpu.memory_space<vmem>>, vector<1x1x10xf32>
    %65 = vector.shape_cast %64 : vector<1x1x10xf32> to vector<1x10xf32>
    %66 = vector.shape_cast %63 : vector<1x10xf32> to vector<1x1x10xf32>
    tpu.vector_store %arg8[%c0_52, %c0_53, %c0_54], %66 {strides = array<i32>} : memref<1x1x10xf32, #tpu.memory_space<vmem>>, vector<1x1x10xf32>,
    return
  }
  func.func @transform_0(%arg0: i32) -> (i32, i32, i32) {
    %c0_i32 = arith.constant 0 : i32
    %c0_i32_0 = arith.constant 0 : i32
    %c0_i32_1 = arith.constant 0 : i32
    return %arg0, %c0_i32, %c0_i32_0 : i32, i32, i32
  }
  func.func @transform_1(%arg0: i32) -> (i32, i32) {
    %c0_i32 = arith.constant 0 : i32
    %c0_i32_0 = arith.constant 0 : i32
    %c0_i32_1 = arith.constant 0 : i32
    return %c0_i32, %c0_i32_0 : i32, i32
  }
  func.func @transform_2(%arg0: i32) -> (i32, i32) {
    %c0_i32 = arith.constant 0 : i32
    %c0_i32_0 = arith.constant 0 : i32
    %c0_i32_1 = arith.constant 0 : i32
    return %c0_i32, %c0_i32_0 : i32, i32
  }
  func.func @transform_3(%arg0: i32) -> (i32, i32) {
    %c0_i32 = arith.constant 0 : i32
    %c0_i32_0 = arith.constant 0 : i32
    %c0_i32_1 = arith.constant 0 : i32
    return %c0_i32, %c0_i32_0 : i32, i32
  }
  func.func @transform_4(%arg0: i32) -> (i32, i32) {
    %c0_i32 = arith.constant 0 : i32
    %c0_i32_0 = arith.constant 0 : i32
    %c0_i32_1 = arith.constant 0 : i32
    return %c0_i32, %c0_i32_0 : i32, i32
  }
  func.func @transform_5(%arg0: i32) -> (i32, i32) {
    %c0_i32 = arith.constant 0 : i32
    %c0_i32_0 = arith.constant 0 : i32
    %c0_i32_1 = arith.constant 0 : i32
    return %c0_i32, %c0_i32_0 : i32, i32
  }
  func.func @transform_6(%arg0: i32) -> (i32, i32) {
    %c0_i32 = arith.constant 0 : i32
    %c0_i32_0 = arith.constant 0 : i32
    %c0_i32_1 = arith.constant 0 : i32
    return %c0_i32, %c0_i32_0 : i32, i32
  }
  func.func @transform_7(%arg0: i32) -> (i32, i32, i32) {
    %c0_i32 = arith.constant 0 : i32
    %c0_i32_0 = arith.constant 0 : i32
    %c0_i32_1 = arith.constant 0 : i32
    return %arg0, %c0_i32, %c0_i32_0 : i32, i32, i32
  }
}

</mosaic_0001>

<bundles_post_ra>
// kernel: my_lstm_forward.1
= control target key start
LH: loop header
LB: loop body
LE: loop exit
PB: predicated region body
PF: predicated region fallthrough
CT: control target
= control target key end

     0   :  { %12 = vsyncpa [#allocation4], 0  ;;  %s5888_s0 = inlined_call_operand.vmem [shape: f32[2,1,1024], index: 0, kind: input, shape index: {}]   ;;  %s5889_s1 = inlined_call_operand.vmem [shape: bf16[96,16], index: 1, kind: input, shape index: {}]   ;;  %s5890_s2 = inlined_call_operand.vmem [shape: f32[96,1], index: 2, kind: input, shape index: {}]   ;;  %s5891_s3 = inlined_call_operand.vmem [shape: bf16[896,320], index: 3, kind: input, shape index: {}]   ;;  %s5892_s4 = inlined_call_operand.vmem [shape: f32[32,320], index: 4, kind: input, shape index: {}]   ;;  %s5893_s5 = inlined_call_operand.vmem [shape: f32[320,10], index: 5, kind: input, shape index: {}]   ;;  %s5894_s6 = inlined_call_operand.vmem [shape: f32[1,10], index: 6, kind: input, shape index: {}]   ;;  %s5895_s7 = inlined_call_operand.hbm [shape: f32[2,1,10], index: 7, kind: output, shape index: {}]  }
   0x1   :  { %14 = vsyncpa [#allocation4 + $0x1], 0  ;;  %s4505_s24 = smov 0   ;;  %s4507_s25 = smov 0  }
   0x2   :  { %s4509_s26 = smov 0   ;;  %s4511_s27 = smov 0  }
   0x3 LB: > { %s4526_s28 = sadd.s32 4294967295, %s4452_s27   ;;  %s3220_s29 = sadd.s32 4294967294, %s4452_s27   ;;  %s4452_s27 = sphi %s4511_s27, %s5926_s27   ;;  %s4448_s26 = sphi %s4509_s26, %s5925_s26   ;;  %s4444_s25 = sphi %s4507_s25, %s5924_s25   ;;  %s4440_s24 = sphi %s4505_s24, %s5923_s24  }
   0x4   : > { %s4530_s30 = sadd.s32 1, %s4452_s27   ;;  %s179_s8 = sadd.s32 1, %s4448_s26 }
   0x5   : > { %s176_s9 = ssub.s32 %s4452_s27, %s4530_s30  ;;  %p189_p0 = scmp.ne.s32.totalorder %s4448_s26, %s4444_s25 }
   0x6   : > { %p177_p1 = scmp.eq.s32.totalorder %s176_s9, 0  ;;  %p190_p2 = scmp.eq.s32.totalorder %s4526_s28, 1 }
   0x7   : > { %p195_p3 = scmp.ne.s32.totalorder %s4444_s25, %s4440_s24  ;;  %p196_p4 = scmp.eq.s32.totalorder %s3220_s29, 1 }
   0x8   : > { %s4541_s10 = scalar_select %p177_p1, %s4448_s26, %s179_s8  }
   0x9   : > { %p4543_p5 = por %p190_p2, %p189_p0  ;;  %p4547_p6 = por %p196_p4, %p195_p3 }
   0xa   : > { %p3223_p7 = scmp.ge.s32.totalorder %s4452_s27, 1  ;;  %p239_p8 = scmp.lt.s32.totalorder %s4452_s27, 3 }
   0xc   : > { %p240_p9 = pnand %p3223_p7, %p239_p8 }
   0xe   : > { %243 = sbr.rel (%p240_p9) target bundleno = 1124 (0x464), region = 48 }
  0x15   : > { %p269_p10 = scmp.lt.s32.totalorder %s4526_s28, 1  ;;  %v4454_v0 = vmov 0.0   ;;  %v289_v1 = vlaneseq  ;;  %s4455_s18 = smov 98   ;;  %v5896_v4 = vmov 0   ;;  %v417_v5 = vld [vmem:[%s5890_s2 + $0x8] sm:$0xff]  ;;  %v416_v6 = vld [vmem:[%s5890_s2] sm:$0xff] }
  0x16   : > { %274 = vst [vmem:[#allocation2] sm:$0xff] %v4454_v0  ;;  %275 = vst [vmem:[#allocation2 + $0x8] sm:$0xff] %v4454_v0  ;;  %s4456_s19 = smov 127   ;;  %s4457_s20 = smov 97   ;;  %569 = vmatprep.mubr.bf16.mxu0 %v5896_v4  ;;  %599 = vmatprep.mubr.bf16.mxu1 %v5896_v4  ;;  %v424_v7 = vld [vmem:[%s5890_s2 + $0x40] sm:$0xff]  ;;  %v425_v8 = vld [vmem:[%s5890_s2 + $0x48] sm:$0xff] }
  0x17   : > { %276 = vst [vmem:[#allocation2 + $0x10] sm:$0xff] %v4454_v0  ;;  %277 = vst [vmem:[#allocation2 + $0x18] sm:$0xff] %v4454_v0  ;;  %s270_s13 = scalar_select %p269_p10, %s4526_s28, 1  ;;  %vm4560_vm0 = vcmp.lt.s32.totalorder %v289_v1, 896  ;;  %3823 = vset.pattern.permute.xlu1 %v5896_v4  ;;  %3822 = vset.pattern.permute.xlu0 %v5896_v4  ;;  %v420_v9 = vld [vmem:[%s5890_s2 + $0x20] sm:$0xff]  ;;  %v421_v10 = vld [vmem:[%s5890_s2 + $0x28] sm:$0xff] }
  0x18   : > { %278 = vst [vmem:[#allocation2 + $0x20] sm:$0xff] %v4454_v0  ;;  %279 = vst [vmem:[#allocation2 + $0x28] sm:$0xff] %v4454_v0  ;;  %s4458_s21 = smov 126   ;;  %s4459_s22 = smov 68   ;;  %v418_v11 = vld [vmem:[%s5890_s2 + $0x10] sm:$0xff]  ;;  %v419_v12 = vld [vmem:[%s5890_s2 + $0x18] sm:$0xff] }
  0x19   : > { %280 = vst [vmem:[#allocation2 + $0x30] sm:$0xff] %v4454_v0  ;;  %281 = vst [vmem:[#allocation2 + $0x38] sm:$0xff] %v4454_v0  ;;  %s3224_s14 = sshll.u32 %s270_s13, 3  ;;  %s4460_s23 = smov 96   ;;  %v426_v13 = vld [vmem:[%s5890_s2 + $0x50] sm:$0xff]  ;;  %v427_v14 = vld [vmem:[%s5890_s2 + $0x58] sm:$0xff] }
  0x1a   : > { %282 = vst [vmem:[#allocation2 + $0x40] sm:$0xff] %v4454_v0  ;;  %283 = vst [vmem:[#allocation2 + $0x48] sm:$0xff] %v4454_v0  ;;  %s272_s17 = scalar_lea.vmem %s5888_s0, %s3224_s14  ;;  %s4461_s29 = smov 66   ;;  %v422_v15 = vld [vmem:[%s5890_s2 + $0x30] sm:$0xff]  ;;  %v423_v16 = vld [vmem:[%s5890_s2 + $0x38] sm:$0xff]  ;;  %vm322_vm1 = vcmask 801792  }
  0x1b   : > { %284 = vst [vmem:[#allocation2 + $0x50] sm:$0xff] %v4454_v0  ;;  %285 = vst [vmem:[#allocation2 + $0x58] sm:$0xff] %v4454_v0  ;;  %v317_v2 = vld [vmem:[%s272_s17] sm:$0xff]  ;;  %s4462_s8 = smov 67   ;;  %vm300_vm2 = vcmask 1039360   ;;  %vm333_vm3 = vcmask 793600  }
  0x1c   : > { %286 = vst [vmem:[#allocation2 + $0x60] sm:$0xff] %v4454_v0  ;;  %287 = vst [vmem:[#allocation2 + $0x68] sm:$0xff] %v4454_v0  ;;  %319 = vrot.lane.b32.xlu1 %v317_v2, %s4455_s18  ;;  %297 = vrot.lane.b32.xlu0 %v317_v2, %s4456_s19  ;;  %vm311_vm4 = vcmask 1031168   ;;  %vm355_vm5 = vcmask 556032   ;;  %vm344_vm6 = vcmask 785408   ;;  %vm377_vm7 = vcmask 539648  }
  0x1d   : > { %293 = vst.msk [vmem:[#allocation2] ss:$8 sm:$0xf] %vm4560_vm0, %v317_v2  ;;  %294 = vst.msk [vmem:[#allocation2] ss:$8 sm:$0x70] %vm4560_vm0, %v317_v2 }
  0x1e   : > { %vm366_vm8 = vcmask 547840   ;;  %v4643_v48 = vld [vmem:[%s5889_s1] sm:$0xff]   ;;  %v4648_v49 = vld [vmem:[%s5889_s1 + $0x18] sm:$0xff]   ;;  %vm518_vm9 = vcmask 130048   ;;  %v3826_v1 = vld [vmem:[%s5889_s1 + $0x8] sm:$0xff]   ;;  %vm2951_vm10 = vcmask 523264  }
  0x1f   : > { %v3832_v63 = vld [vmem:[%s5891_s3 + $0x4] ss:$12 sps:$4 sm:$0xff]   ;;  %vm3134_vm11 = vcmask 80896   ;;  %s267_s9 = sand.u32 1, %s4444_s25   ;;  %s3483_s15 = sshll.u32 %s4526_s28, 4  ;;  %vm3150_vm12 = vcmask 73728  }
  0x20   : > { %330 = vrot.lane.b32.xlu1 %v317_v2, %s4457_s20  ;;  %308 = vrot.lane.b32.xlu0 %v317_v2, %s4458_s21  ;;  %v3828_v3 = vld [vmem:[%s5889_s1 + $0x10] sm:$0xff]   ;;  %s268_s16 = scalar_lea.vmem [#allocation3], %s267_s9  ;;  %s5846_s20 = scalar_lea.hbm %s5895_s7, %s3483_s15 }
  0x21   : > { %s3165_s17 = sshll.u32 %s268_s16, 4  ;;  %s3153_s21 = scalar_lea.sflag [#allocation4], %s267_s9  ;;  %s5848_s17 = int_to_ptr.vmem [resolvable:$true] %s3165_s17 }
  0x22   : > { %s4464_s28 = smov [#allocation3]  }
  0x24   : > { %352 = vrot.lane.b32.xlu1 %v317_v2, %s4459_s22  ;;  %341 = vrot.lane.b32.xlu0 %v317_v2, %s4460_s23  ;;  %s4390_s22 = scalar_lea.vmem %s5848_s17, 16  ;;  %s4394_s23 = sshll.u32 %s4464_s28, 4  ;;  %s4395_s23 = int_to_ptr.vmem [resolvable:$false] %s4394_s23 }
  0x25   : > { %p4391_p11 = scmp.ne.s32.totalorder %s5848_s17, %s4390_s22  ;;  %p4397_p0 = scmp.lt.s32.totalorder %s5848_s17, %s4395_s23 }
  0x27   : > { %p4392_p12 = pnand %p4391_p11, %p4543_p5 }
  0x28   : > { %374 = vrot.lane.b32.xlu1 %v317_v2, %s4461_s29  ;;  %363 = vrot.lane.b32.xlu0 %v317_v2, %s4462_s8  ;;  %v3827_v2 = vld [vmem:[%s5889_s1 + $0x20] sm:$0xff]   ;;  %s4396_s29 = scalar_lea.vmem %s4395_s23, 32 }
  0x29   : > { %p4393_p13 = pneg %p4392_p12  ;;  %p4398_p1 = scmp.lt.s32.totalorder %s4396_s29, %s4390_s22 }
  0x2b   : > { %p4399_p2 = por %p4398_p1, %p4397_p0 }
  0x2c   : > { %435 = vperm.xlu1 %3823, %v417_v5   ;;  %430 = vperm.xlu0 %3822, %v416_v6   ;;  %v3829_v5 = vld [vmem:[%s5889_s1 + $0x28] sm:$0xff]  }
  0x2d   : > { %v3830_v6 = vld [vmem:[%s5891_s3] ss:$12 sps:$4 sm:$0xff]   ;;  %p4400_p3 = pnand %p4399_p2, %p4393_p13 }
  0x30   : > { %470 = vperm.xlu1 %3823, %v424_v7   ;;  %475 = vperm.xlu0 %3822, %v425_v8   ;;  %v3835_v7 = vld [vmem:[%s5891_s3 + $0x1c] ss:$12 sps:$4 sm:$0xff]   ;;  %v3833_v8 = vld [vmem:[%s5891_s3 + $0x18] ss:$12 sps:$4 sm:$0xff]  }
  0x34   : > { %450 = vperm.xlu1 %3823, %v420_v9   ;;  %455 = vperm.xlu0 %3822, %v421_v10   ;;  %v3838_v9 = vld [vmem:[%s5891_s3 + $0x34] ss:$12 sps:$4 sm:$0xff]   ;;  %v3836_v10 = vld [vmem:[%s5891_s3 + $0x30] ss:$12 sps:$4 sm:$0xff]  }
  0x38   : > { %440 = vperm.xlu1 %3823, %v418_v11   ;;  %445 = vperm.xlu0 %3822, %v419_v12   ;;  %v3841_v11 = vld [vmem:[%s5891_s3 + $0x4c] ss:$12 sps:$4 sm:$0xff]   ;;  %v3839_v12 = vld [vmem:[%s5891_s3 + $0x48] ss:$12 sps:$4 sm:$0xff]  }
  0x3c   : > { %480 = vperm.xlu1 %3823, %v426_v13   ;;  %485 = vperm.xlu0 %3822, %v427_v14   ;;  %v3844_v13 = vld [vmem:[%s5891_s3 + $0x64] ss:$12 sps:$4 sm:$0xff]   ;;  %v3842_v14 = vld [vmem:[%s5891_s3 + $0x60] ss:$12 sps:$4 sm:$0xff]  }
  0x40   : > { %460 = vperm.xlu1 %3823, %v422_v15   ;;  %465 = vperm.xlu0 %3822, %v423_v16   ;;  %v3847_v15 = vld [vmem:[%s5891_s3 + $0x7c] ss:$12 sps:$4 sm:$0xff]   ;;  %v3845_v16 = vld [vmem:[%s5891_s3 + $0x78] ss:$12 sps:$4 sm:$0xff]  }
  0x8e   : > { %v320_v17 = vpop.permute.xlu1 %319  ;;  %v298_v18 = vpop.permute.xlu0 %297 }
  0x8f   : > { %v321_v19 = vrot.slane %v320_v17, 1  ;;  %v299_v20 = vrot.slane %v298_v18, 1 }
  0x91   : > { %v323_v21 = vsel %vm322_vm1, %v320_v17, %v321_v19  ;;  %v301_v22 = vsel %vm300_vm2, %v298_v18, %v299_v20  ;;  %v3850_v17 = vld [vmem:[%s5891_s3 + $0x94] ss:$12 sps:$4 sm:$0xff]   ;;  %v3848_v18 = vld [vmem:[%s5891_s3 + $0x90] ss:$12 sps:$4 sm:$0xff]   ;;  %v3853_v19 = vld [vmem:[%s5891_s3 + $0xac] ss:$12 sps:$4 sm:$0xff]  }
  0x92   : > { %326 = vst.msk [vmem:[#allocation2 + $0x3] ss:$8 sm:$0xf] %vm4560_vm0, %v323_v21  ;;  %327 = vst.msk [vmem:[#allocation2 + $0x3] ss:$8 sm:$0x70] %vm4560_vm0, %v323_v21  ;;  %v331_v23 = vpop.permute.xlu1 %330  ;;  %v309_v24 = vpop.permute.xlu0 %308 }
  0x93   : > { %304 = vst.msk [vmem:[#allocation2 + $0x1] ss:$8 sm:$0xf] %vm4560_vm0, %v301_v22  ;;  %305 = vst.msk [vmem:[#allocation2 + $0x1] ss:$8 sm:$0x70] %vm4560_vm0, %v301_v22 }
  0x94   : > { %v332_v25 = vrot.slane %v331_v23, 1  ;;  %v310_v26 = vrot.slane %v309_v24, 1  ;;  %v3851_v20 = vld [vmem:[%s5891_s3 + $0xa8] ss:$12 sps:$4 sm:$0xff]   ;;  %v3856_v21 = vld [vmem:[%s5891_s3 + $0xc4] ss:$12 sps:$4 sm:$0xff]  }
  0x95   : > { %v3854_v22 = vld [vmem:[%s5891_s3 + $0xc0] ss:$12 sps:$4 sm:$0xff]  }
  0x96   : > { %v334_v27 = vsel %vm333_vm3, %v331_v23, %v332_v25  ;;  %v312_v28 = vsel %vm311_vm4, %v309_v24, %v310_v26  ;;  %v353_v29 = vpop.permute.xlu1 %352  ;;  %v342_v30 = vpop.permute.xlu0 %341  ;;  %v3857_v23 = vld [vmem:[%s5891_s3 + $0xc8] ss:$12 sps:$4 sm:$0xff]   ;;  %v3859_v26 = vld [vmem:[%s5891_s3 + $0xd8] ss:$12 sps:$4 sm:$0xff]  }
  0x97   : > { %337 = vst.msk [vmem:[#allocation2 + $0x4] ss:$8 sm:$0xf] %vm4560_vm0, %v334_v27  ;;  %338 = vst.msk [vmem:[#allocation2 + $0x4] ss:$8 sm:$0x70] %vm4560_vm0, %v334_v27 }
  0x98   : > { %315 = vst.msk [vmem:[#allocation2 + $0x2] ss:$8 sm:$0xf] %vm4560_vm0, %v312_v28  ;;  %316 = vst.msk [vmem:[#allocation2 + $0x2] ss:$8 sm:$0x70] %vm4560_vm0, %v312_v28 }
  0x99   : > { %v354_v31 = vrot.slane %v353_v29, 1  ;;  %v343_v32 = vrot.slane %v342_v30, 1  ;;  %v3858_v24 = vld [vmem:[%s5891_s3 + $0x8] ss:$12 sps:$4 sm:$0xff]   ;;  %v3862_v27 = vld [vmem:[%s5891_s3 + $0xe0] ss:$12 sps:$4 sm:$0xff]  }
  0x9a   : > { %v375_v35 = vpop.permute.xlu1 %374  ;;  %v364_v36 = vpop.permute.xlu0 %363  ;;  %v3861_v25 = vld [vmem:[%s5891_s3 + $0xdc] ss:$12 sps:$4 sm:$0xff]   ;;  %v3863_v28 = vld [vmem:[%s5891_s3 + $0x20] ss:$12 sps:$4 sm:$0xff]  }
  0x9b   : > { %v356_v33 = vsel %vm355_vm5, %v353_v29, %v354_v31  ;;  %v345_v34 = vsel %vm344_vm6, %v342_v30, %v343_v32  ;;  %v376_v37 = vrot.slane %v375_v35, 1  ;;  %v365_v38 = vrot.slane %v364_v36, 1  ;;  %v3866_v29 = vld [vmem:[%s5891_s3 + $0xf4] ss:$12 sps:$4 sm:$0xff]   ;;  %v3864_v30 = vld [vmem:[%s5891_s3 + $0xf0] ss:$12 sps:$4 sm:$0xff]  }
  0x9c   : > { %359 = vst.msk [vmem:[#allocation2 + $0x6] ss:$8 sm:$0xf] %vm4560_vm0, %v356_v33  ;;  %360 = vst.msk [vmem:[#allocation2 + $0x6] ss:$8 sm:$0x70] %vm4560_vm0, %v356_v33 }
  0x9d   : > { %348 = vst.msk [vmem:[#allocation2 + $0x5] ss:$8 sm:$0xf] %vm4560_vm0, %v345_v34  ;;  %349 = vst.msk [vmem:[#allocation2 + $0x5] ss:$8 sm:$0x70] %vm4560_vm0, %v345_v34  ;;  %v378_v39 = vsel %vm377_vm7, %v375_v35, %v376_v37  ;;  %v367_v40 = vsel %vm366_vm8, %v364_v36, %v365_v38 }
  0x9e   : > { %381 = vst.msk [vmem:[#allocation2 + $0x38] ss:$8 sm:$0xf] %vm4560_vm0, %v378_v39  ;;  %382 = vst.msk [vmem:[#allocation2 + $0x38] ss:$8 sm:$0x70] %vm4560_vm0, %v378_v39 }
  0x9f   : > { %370 = vst.msk [vmem:[#allocation2 + $0x7] ss:$8 sm:$0xf] %vm4560_vm0, %v367_v40  ;;  %371 = vst.msk [vmem:[#allocation2 + $0x7] ss:$8 sm:$0x70] %vm4560_vm0, %v367_v40 }
  0xa0   : > { %v3867_v31 = vld [vmem:[%s5891_s3 + $0xf8] ss:$12 sps:$4 sm:$0xff]   ;;  %v3869_v34 = vld [vmem:[%s5891_s3 + $0x108] ss:$12 sps:$4 sm:$0xff]   ;;  %v3872_v35 = vld [vmem:[%s5891_s3 + $0x110] ss:$12 sps:$4 sm:$0xff]  }
  0xa1   : > { %v3868_v32 = vld [vmem:[%s5891_s3 + $0x38] ss:$12 sps:$4 sm:$0xff]   ;;  %v3873_v36 = vld [vmem:[%s5891_s3 + $0x50] ss:$12 sps:$4 sm:$0xff]   ;;  %v3874_v38 = vld [vmem:[%s5891_s3 + $0x120] ss:$12 sps:$4 sm:$0xff]  }
  0xa2   : > { %v3871_v33 = vld [vmem:[%s5891_s3 + $0x10c] ss:$12 sps:$4 sm:$0xff]   ;;  %v3876_v37 = vld [vmem:[%s5891_s3 + $0x124] ss:$12 sps:$4 sm:$0xff]   ;;  %v3877_v39 = vld [vmem:[%s5891_s3 + $0x128] ss:$12 sps:$4 sm:$0xff]  }
  0xa3   : > { %v3878_v40 = vld [vmem:[%s5891_s3 + $0x68] ss:$12 sps:$4 sm:$0xff]  }
  0xa5   : > { %v391_v42 = vld [vmem:[#allocation2 + $0x40] sm:$0xff]  ;;  %v390_v45 = vld [vmem:[#allocation2 + $0x38] sm:$0xff]  ;;  %v393_v47 = vld [vmem:[#allocation2 + $0x50] sm:$0xff] }
  0xa6   : > { %v384_v41 = vld [vmem:[#allocation2 + $0x8] sm:$0xff]  ;;  %v383_v43 = vld [vmem:[#allocation2] sm:$0xff]  ;;  %v386_v46 = vld [vmem:[#allocation2 + $0x18] sm:$0xff] }
  0xa7   : > { %v398_v44 = vpack.c.bf16 %v391_v42, %v384_v41  ;;  %v397_v50 = vpack.c.bf16 %v390_v45, %v383_v43  ;;  %v388_v51 = vld [vmem:[#allocation2 + $0x28] sm:$0xff]  ;;  %v395_v52 = vld [vmem:[#allocation2 + $0x60] sm:$0xff]  ;;  %v385_v53 = vld [vmem:[#allocation2 + $0x10] sm:$0xff]  ;;  %v400_v54 = vpack.c.bf16 %v393_v47, %v386_v46 }
  0xa8   : > { %v402_v55 = vpack.c.bf16 %v395_v52, %v388_v51  ;;  %v392_v56 = vld [vmem:[#allocation2 + $0x48] sm:$0xff]  ;;  %v387_v57 = vld [vmem:[#allocation2 + $0x20] sm:$0xff]  ;;  %v394_v58 = vld [vmem:[#allocation2 + $0x58] sm:$0xff] }
  0xa9   : > { %537 = vmatprep.subr.bf16.mxu0 %v398_v44  ;;  %3747 = vmatprep.subr.bf16.mxu1 %v398_v44  ;;  %v389_v59 = vld [vmem:[#allocation2 + $0x30] sm:$0xff]  ;;  %v396_v60 = vld [vmem:[#allocation2 + $0x68] sm:$0xff]  ;;  %v399_v61 = vpack.c.bf16 %v392_v56, %v385_v53  ;;  %v401_v62 = vpack.c.bf16 %v394_v58, %v387_v57  ;;  %v3879_v42 = vld [vmem:[%s5891_s3 + $0x138] ss:$12 sps:$4 sm:$0xff]  }
  0xaa   : > { %538 = vmatpush1.bf16.msra.mxu0 %v397_v50  ;;  %3748 = vmatpush1.bf16.msra.mxu1 %v397_v50  ;;  %v403_v0 = vpack.c.bf16 %v396_v60, %v389_v59  ;;  %v3881_v41 = vld [vmem:[%s5891_s3 + $0x13c] ss:$12 sps:$4 sm:$0xff]   ;;  %v3882_v43 = vld [vmem:[%s5891_s3 + $0x140] ss:$12 sps:$4 sm:$0xff]   ;;  %v3887_v47 = vld [vmem:[%s5891_s3 + $0x158] ss:$12 sps:$4 sm:$0xff]  }
  0xab   : > { %630 = vmatprep.subr.bf16.mxu1 %v400_v54  ;;  %723 = vmatprep.subr.bf16.mxu0 %v402_v55  ;;  %v3883_v44 = vld [vmem:[%s5891_s3 + $0x80] ss:$12 sps:$4 sm:$0xff]   ;;  %v3884_v46 = vld [vmem:[%s5891_s3 + $0x150] ss:$12 sps:$4 sm:$0xff]   ;;  %v3889_v50 = vld [vmem:[%s5891_s3 + $0x168] ss:$12 sps:$4 sm:$0xff]   ;;  %v4854_v53 = vpop.permute.xlu1 %435  ;;  %v4859_v55 = vpop.permute.xlu0 %430 }
  0xac   : > { %v3886_v45 = vld [vmem:[%s5891_s3 + $0x154] ss:$12 sps:$4 sm:$0xff]   ;;  %v3892_v51 = vld [vmem:[%s5891_s3 + $0x170] ss:$12 sps:$4 sm:$0xff]   ;;  %5906 = vst [vmem:[#allocation6_spill] sm:$0xff] %v4854_v53  ;;  %5907 = vst [vmem:[#allocation7_spill] sm:$0xff] %v4859_v55 }
  0xad   : > { %3231 = vmatmul.mubr.msk.bf16.vlgmr.msra.gmra.mrb[0].mxu0 %vm518_vm9, %v4643_v48  ;;  %3234 = vmatmul.mubr.msk.bf16.vlgmr.msra.gmra.mrb[0].mxu1 %vm518_vm9, %v4648_v49  ;;  %v3893_v52 = vld [vmem:[%s5891_s3 + $0xb0] ss:$12 sps:$4 sm:$0xff]  }
  0xae   : > { %631 = vmatpush1.bf16.msra.mxu1 %v399_v61  ;;  %724 = vmatpush1.bf16.msra.mxu0 %v401_v62  ;;  %v3896_v54 = vld [vmem:[%s5891_s3 + $0x184] ss:$12 sps:$4 sm:$0xff]  }
  0xaf   : > { %3643 = vmatprep.subr.bf16.mxu1 %v403_v0  ;;  %579 = vmatprep.mubr.bf16.mxu0 %v5896_v4  ;;  %v4861_v56 = vpop.permute.xlu1 %470  ;;  %v4863_v57 = vpop.permute.xlu0 %475 }
  0xb0   : > { %609 = vmatprep.mubr.bf16.mxu1 %v5896_v4  ;;  %2479 = vmatprep.subr.bf16.mxu0 %v3832_v63  ;;  %v3903_v63 = vld [vmem:[%s5891_s3 + $0x248] ss:$12 sps:$4 sm:$0xff]  }
  0xb3   : > { %v4865_v58 = vpop.permute.xlu1 %450  ;;  %v4867_v59 = vpop.permute.xlu0 %455 }
  0xb4   : > { %5908 = vst [vmem:[#allocation8_spill] sm:$0xff] %v4867_v59 }
  0xb5   : > { %3232 = vmatmul.mubr.msk.bf16.gmra.mrb[4].mxu0 %vm518_vm9, %v3826_v1  ;;  %3235 = vmatmul.mubr.msk.bf16.gmra.mrb[4].mxu1 %vm518_vm9, %v3827_v2 }
  0xb6   : > { %589 = vmatprep.mubr.bf16.mxu0 %v5896_v4  ;;  %619 = vmatprep.mubr.bf16.mxu1 %v5896_v4 }
  0xb7   : > { %v4869_v60 = vpop.permute.xlu1 %440  ;;  %v4871_v61 = vpop.permute.xlu0 %445 }
  0xb8   : > { %5909 = vst [vmem:[#allocation9_spill] sm:$0xff] %v4869_v60 }
  0xbb   : > { %v4873_v62 = vpop.permute.xlu1 %480 }
  0xbd   : > { %3233 = vmatmul.mubr.msk.bf16.gmra.mrb[8].mxu0 %vm518_vm9, %v3828_v3  ;;  %3236 = vmatmul.mubr.msk.bf16.gmra.mrb[8].mxu1 %vm518_vm9, %v3829_v5 }
  0xbe   : > { %662 = vmatprep.mubr.bf16.mxu1 %v5896_v4  ;;  %755 = vmatprep.mubr.bf16.mxu0 %v5896_v4 }
  0xc5   : > { %3237 = vmatmul.mubr.msk.bf16.vlgmr.msra.gmra.mrb[12].mxu1 %vm518_vm9, %v4643_v48  ;;  %3243 = vmatmul.mubr.msk.bf16.vlgmr.msra.gmra.mrb[12].mxu0 %vm518_vm9, %v4643_v48 }
  0xc6   : > { %3644 = vmatpush3.bf16.msra.mxu1 %v403_v0  ;;  %672 = vmatprep.mubr.bf16.mxu1 %v5896_v4  ;;  %v4878_v0 = vpop.permute.xlu0 %485 }
  0xc7   : > { %765 = vmatprep.mubr.bf16.mxu0 %v5896_v4  ;;  %2480 = vmatpush1.bf16.msra.mxu0 %v3830_v6 }
  0xc8   : > { %2481 = vmatprep.subr.bf16.mxu0 %v3835_v7  ;;  %3493 = vmatprep.subr.bf16.mxu1 %v3857_v23 }
  0xcb   : > { %2482 = vmatpush1.bf16.msra.mxu0 %v3833_v8 }
  0xcc   : > { %2483 = vmatprep.subr.bf16.mxu0 %v3838_v9 }
  0xcd   : > { %3238 = vmatmul.mubr.msk.bf16.gmra.mrb[16].mxu1 %vm518_vm9, %v3826_v1  ;;  %3244 = vmatmul.mubr.msk.bf16.gmra.mrb[16].mxu0 %vm518_vm9, %v3826_v1 }
  0xce   : > { %682 = vmatprep.mubr.bf16.mxu1 %v5896_v4  ;;  %775 = vmatprep.mubr.bf16.mxu0 %v5896_v4 }
  0xcf   : > { %2484 = vmatpush1.bf16.msra.mxu0 %v3836_v10 }
  0xd0   : > { %2485 = vmatprep.subr.bf16.mxu0 %v3841_v11 }
  0xd3   : > { %2486 = vmatpush1.bf16.msra.mxu0 %v3839_v12 }
  0xd4   : > { %2487 = vmatprep.subr.bf16.mxu0 %v3844_v13 }
  0xd5   : > { %3239 = vmatmul.mubr.msk.bf16.gmra.mrb[20].mxu1 %vm518_vm9, %v3828_v3  ;;  %3245 = vmatmul.mubr.msk.bf16.gmra.mrb[20].mxu0 %vm518_vm9, %v3828_v3 }
  0xd6   : > { %692 = vmatprep.mubr.bf16.mxu1 %v5896_v4  ;;  %785 = vmatprep.mubr.bf16.mxu0 %v5896_v4 }
  0xd7   : > { %2488 = vmatpush1.bf16.msra.mxu0 %v3842_v14 }
  0xd8   : > { %2489 = vmatprep.subr.bf16.mxu0 %v3847_v15 }
  0xdb   : > { %2490 = vmatpush1.bf16.msra.mxu0 %v3845_v16 }
  0xdc   : > { %2491 = vmatprep.subr.bf16.mxu0 %v3850_v17  ;;  %v4886_v17 = vpop.permute.xlu0 %465 }
  0xdd   : > { %3240 = vmatmul.mubr.msk.bf16.gmra.mrb[24].mxu1 %vm518_vm9, %v4648_v49  ;;  %3246 = vmatmul.mubr.msk.bf16.gmra.mrb[24].mxu0 %vm518_vm9, %v4648_v49 }
  0xde   : > { %702 = vmatprep.mubr.bf16.mxu1 %v5896_v4  ;;  %795 = vmatprep.mubr.bf16.mxu0 %v5896_v4 }
  0xdf   : > { %2492 = vmatpush1.bf16.msra.mxu0 %v3848_v18 }
  0xe0   : > { %2493 = vmatprep.subr.bf16.mxu0 %v3853_v19 }
  0xe3   : > { %2494 = vmatpush1.bf16.msra.mxu0 %v3851_v20 }
  0xe4   : > { %2495 = vmatprep.subr.bf16.mxu0 %v3856_v21 }
  0xe5   : > { %3241 = vmatmul.mubr.msk.bf16.gmra.mrb[28].mxu1 %vm518_vm9, %v3827_v2  ;;  %3247 = vmatmul.mubr.msk.bf16.gmra.mrb[28].mxu0 %vm518_vm9, %v3827_v2 }
  0xe6   : > { %712 = vmatprep.mubr.bf16.mxu1 %v5896_v4  ;;  %805 = vmatprep.mubr.bf16.mxu0 %v5896_v4 }
  0xe7   : > { %2496 = vmatpush1.bf16.msra.mxu0 %v3854_v22 }
  0xe8   : > { %2497 = vmatprep.subr.bf16.mxu0 %v3861_v25 }
  0xeb   : > { %2498 = vmatpush1.bf16.msra.mxu0 %v3859_v26 }
  0xec   : > { %2499 = vmatprep.subr.bf16.mxu0 %v3866_v29 }
  0xed   : > { %3242 = vmatmul.mubr.msk.bf16.gmra.mrb[32].mxu1 %vm518_vm9, %v3829_v5  ;;  %3248 = vmatmul.mubr.msk.bf16.gmra.mrb[32].mxu0 %vm518_vm9, %v3829_v5 }
  0xee   : > { %3645 = vmatprep.mubr.msk.bf16.mxu1 %vm518_vm9, %v4643_v48  ;;  %v3888_v48 = vld [vmem:[%s5891_s3 + $0x98] ss:$12 sps:$4 sm:$0xff]  }
  0xef   : > { %2500 = vmatpush1.bf16.msra.mxu0 %v3864_v30 }
  0xf0   : > { %2501 = vmatprep.subr.bf16.mxu0 %v3871_v33 }
  0xf3   : > { %2502 = vmatpush1.bf16.msra.mxu0 %v3869_v34 }
  0xf4   : > { %2503 = vmatprep.subr.bf16.mxu0 %v3876_v37 }
  0xf5   : > { %3646 = vmatmul.mubr.msk.bf16.vlgmr.msra.gmra.mrb[36].mxu1 %vm518_vm9, %v3826_v1  ;;  %v4880_v1 = vpop.permute.xlu1 %460 }
  0xf6   : > { %3649 = vmatprep.mubr.msk.bf16.mxu1 %vm518_vm9, %v3828_v3  ;;  %3494 = vmatpush3.bf16.msra.mxu1 %v3858_v24 }
  0xf7   : > { %3495 = vmatprep.subr.bf16.mxu1 %v3862_v27  ;;  %2504 = vmatpush1.bf16.msra.mxu0 %v3874_v38 }
  0xf8   : > { %2505 = vmatprep.subr.bf16.mxu0 %v3881_v41 }
  0xfa   : > { %3496 = vmatpush3.bf16.msra.mxu1 %v3863_v28 }
  0xfb   : > { %3497 = vmatprep.subr.bf16.mxu1 %v3867_v31  ;;  %2506 = vmatpush1.bf16.msra.mxu0 %v3879_v42 }
  0xfc   : > { %2507 = vmatprep.subr.bf16.mxu0 %v3886_v45 }
  0xfd   : > { %3650 = vmatmul.mubr.msk.bf16.gmra.mrb[40].mxu1 %vm518_vm9, %v4648_v49  ;;  %v3891_v49 = vld [vmem:[%s5891_s3 + $0x16c] ss:$12 sps:$4 sm:$0xff]  }
  0xfe   : > { %3653 = vmatprep.mubr.msk.bf16.mxu1 %vm518_vm9, %v3827_v2  ;;  %3498 = vmatpush3.bf16.msra.mxu1 %v3868_v32 }
  0xff   : > { %3499 = vmatprep.subr.bf16.mxu1 %v3872_v35  ;;  %2508 = vmatpush1.bf16.msra.mxu0 %v3884_v46 }
 0x100   : > { %2509 = vmatprep.subr.bf16.mxu0 %v3891_v49 }
 0x102   : > { %3500 = vmatpush3.bf16.msra.mxu1 %v3873_v36 }
 0x103   : > { %3501 = vmatprep.subr.bf16.mxu1 %v3877_v39  ;;  %2510 = vmatpush1.bf16.msra.mxu0 %v3889_v50 }
 0x104   : > { %2532 = vmatprep.subr.bf16.mxu0 %v3896_v54 }
 0x105   : > { %3654 = vmatmul.mubr.msk.bf16.gmra.mrb[44].mxu1 %vm518_vm9, %v3829_v5 }
 0x106   : > { %3502 = vmatpush3.bf16.msra.mxu1 %v3878_v40 }
 0x107   : > { %3503 = vmatprep.subr.bf16.mxu1 %v3882_v43 }
 0x10a   : > { %3504 = vmatpush3.bf16.msra.mxu1 %v3883_v44 }
 0x10b   : > { %3505 = vmatprep.subr.bf16.mxu1 %v3887_v47 }
 0x10e   : > { %3506 = vmatpush3.bf16.msra.mxu1 %v3888_v48 }
 0x10f   : > { %3507 = vmatprep.subr.bf16.mxu1 %v3892_v51 }
 0x112   : > { %3508 = vmatpush3.bf16.msra.mxu1 %v3893_v52 }
 0x113   : > { %3521 = vmatprep.subr.bf16.mxu1 %v3903_v63 }
 0x180   : > { %v571_v2 = vpop.f32.mrb[0].mxu0  ;;  %v601_v3 = vpop.f32.mrb[0].mxu1 }
 0x181   : > { %v572_v5 = vadd.f32 %v571_v2, %v4859_v55  ;;  %v573_v6 = vpop.f32.mrb[1].mxu0  ;;  %v603_v7 = vpop.f32.mrb[1].mxu1  ;;  %v602_v19 = vadd.f32 %v601_v3, %v4880_v1 }
 0x182   : > { %v574_v8 = vadd.f32 %v573_v6, %v4859_v55  ;;  %v575_v9 = vpop.f32.mrb[2].mxu0  ;;  %v605_v10 = vpop.f32.mrb[2].mxu1  ;;  %v604_v21 = vadd.f32 %v603_v7, %v4880_v1 }
 0x183   : > { %v3255_v11 = vmul.f32 -1.442695, %v572_v5  ;;  %v576_v12 = vadd.f32 %v575_v9, %v4854_v53  ;;  %v577_v13 = vpop.f32.mrb[3].mxu0  ;;  %v607_v14 = vpop.f32.mrb[3].mxu1  ;;  %v606_v22 = vadd.f32 %v605_v10, %v4886_v17 }
 0x184   : > { %v3256_v15 = vmul.f32 -1.442695, %v574_v8  ;;  %v578_v16 = vadd.f32 %v577_v13, %v4854_v53  ;;  %v608_v23 = vadd.f32 %v607_v14, %v4886_v17 }
 0x185   : > { %4054 = vpow2.f32 %v3255_v11  ;;  %v3262_v18 = vmul.f32 -1.442695, %v576_v12 }
 0x186   : > { %4056 = vpow2.f32 %v3256_v15  ;;  %v3263_v20 = vmul.f32 -1.442695, %v578_v16 }
 0x187   : > { %4058 = vpow2.f32 %v3262_v18 }
 0x188   : > { %4060 = vpow2.f32 %v3263_v20  ;;  %v581_v24 = vpop.f32.mrb[4].mxu0  ;;  %v611_v25 = vpop.f32.mrb[4].mxu1 }
 0x189   : > { %4062 = vtanh.f32 %v602_v19  ;;  %v582_v26 = vadd.f32 %v581_v24, %v4869_v60  ;;  %v612_v27 = vadd.f32 %v611_v25, %v4861_v56  ;;  %v583_v28 = vpop.f32.mrb[5].mxu0  ;;  %v613_v29 = vpop.f32.mrb[5].mxu1 }
 0x18a   : > { %4064 = vtanh.f32 %v604_v21  ;;  %v584_v30 = vadd.f32 %v583_v28, %v4869_v60  ;;  %v614_v31 = vadd.f32 %v613_v29, %v4861_v56  ;;  %v585_v32 = vpop.f32.mrb[6].mxu0  ;;  %v615_v33 = vpop.f32.mrb[6].mxu1 }
 0x18b   : > { %4066 = vtanh.f32 %v606_v22  ;;  %v3269_v34 = vmul.f32 -1.442695, %v582_v26  ;;  %v3283_v35 = vmul.f32 -1.442695, %v612_v27  ;;  %v586_v36 = vadd.f32 %v585_v32, %v4871_v61  ;;  %v587_v37 = vpop.f32.mrb[7].mxu0  ;;  %v617_v38 = vpop.f32.mrb[7].mxu1 }
 0x18c   : > { %4068 = vtanh.f32 %v608_v23  ;;  %v3270_v39 = vmul.f32 -1.442695, %v584_v30  ;;  %v3284_v40 = vmul.f32 -1.442695, %v614_v31  ;;  %v616_v42 = vadd.f32 %v615_v33, %v4863_v57 }
 0x18d   : > { %4070 = vpow2.f32 %v3269_v34  ;;  %v3276_v41 = vmul.f32 -1.442695, %v586_v36  ;;  %v588_v44 = vadd.f32 %v587_v37, %v4871_v61  ;;  %v618_v47 = vadd.f32 %v617_v38, %v4863_v57 }
 0x18e   : > { %4072 = vpow2.f32 %v3283_v35  ;;  %v3290_v3 = vmul.f32 -1.442695, %v616_v42 }
 0x18f   : > { %v4055_v43 = vpop.eup %4054  ;;  %4074 = vpow2.f32 %v3270_v39  ;;  %v3277_v9 = vmul.f32 -1.442695, %v588_v44  ;;  %v3291_v13 = vmul.f32 -1.442695, %v618_v47 }
 0x190   : > { %v4057_v45 = vpop.eup %4056  ;;  %v981_v46 = vadd.f32 1.0, %v4055_v43  ;;  %4076 = vpow2.f32 %v3284_v40  ;;  %v591_v48 = vpop.f32.mrb[8].mxu0 }
 0x191   : > { %v621_v49 = vpop.f32.mrb[8].mxu1  ;;  %v4059_v50 = vpop.eup %4058  ;;  %v982_v51 = vadd.f32 1.0, %v4057_v45  ;;  %4078 = vpow2.f32 %v3276_v41  ;;  %v592_v15 = vadd.f32 %v591_v48, %v4865_v58 }
 0x192   : > { %v593_v52 = vpop.f32.mrb[9].mxu0  ;;  %v623_v54 = vpop.f32.mrb[9].mxu1  ;;  %4080 = vrcp.f32 %v981_v46  ;;  %v988_v2 = vadd.f32 1.0, %v4059_v50  ;;  %v622_v19 = vadd.f32 %v621_v49, %v4873_v62 }
 0x193   : > { %v4061_v63 = vpop.eup %4060  ;;  %v595_v5 = vpop.f32.mrb[10].mxu0  ;;  %4082 = vrcp.f32 %v982_v51  ;;  %v624_v26 = vadd.f32 %v623_v54, %v4873_v62  ;;  %v594_v39 = vadd.f32 %v593_v52, %v4865_v58 }
 0x194   : > { %v625_v6 = vpop.f32.mrb[10].mxu1  ;;  %v4900_v7 = vpop.eup %4062  ;;  %v989_v8 = vadd.f32 1.0, %v4061_v63  ;;  %4084 = vrcp.f32 %v988_v2  ;;  %v3297_v35 = vmul.f32 -1.442695, %v622_v19  ;;  %v596_v44 = vadd.f32 %v595_v5, %v4867_v59 }
 0x195   : > { %v4902_v10 = vpop.f32.mrb[11].mxu0  ;;  %v4904_v11 = vpop.f32.mrb[11].mxu1  ;;  %v3298_v42 = vmul.f32 -1.442695, %v624_v26  ;;  %v626_v47 = vadd.f32 %v625_v6, %v4878_v0 }
 0x196   : > { %v4906_v12 = vpop.eup %4064  ;;  %4086 = vrcp.f32 %v989_v8 }
 0x197   : > { %v4908_v14 = vpop.eup %4066  ;;  %4088 = vpow2.f32 %v3290_v3 }
 0x198   : > { %v4911_v16 = vpop.eup %4068  ;;  %4090 = vpow2.f32 %v3277_v9  ;;  %v4914_v22 = vpop.f32.mrb[12].mxu1 }
 0x199   : > { %v4071_v18 = vpop.eup %4070  ;;  %4092 = vpow2.f32 %v3291_v13  ;;  %v4916_v23 = vpop.f32.mrb[12].mxu0 }
 0x19a   : > { %v4073_v20 = vpop.eup %4072  ;;  %v995_v21 = vadd.f32 1.0, %v4071_v18  ;;  %4094 = vtanh.f32 %v592_v15  ;;  %v4919_v27 = vpop.f32.mrb[13].mxu1  ;;  %v3304_v18 = vmul.f32 -1.442695, %v626_v47 }
 0x19b   : > { %v4075_v24 = vpop.eup %4074  ;;  %v1177_v25 = vadd.f32 1.0, %v4073_v20  ;;  %v4921_v28 = vpop.f32.mrb[13].mxu0 }
 0x19c   : > { %v4077_v29 = vpop.eup %4076  ;;  %4096 = vrcp.f32 %v995_v21  ;;  %v996_v30 = vadd.f32 1.0, %v4075_v24  ;;  %v4923_v31 = vpop.f32.mrb[14].mxu1 }
 0x19d   : > { %v4925_v32 = vpop.f32.mrb[14].mxu0  ;;  %v4079_v33 = vpop.eup %4078  ;;  %4098 = vrcp.f32 %v1177_v25  ;;  %v1178_v34 = vadd.f32 1.0, %v4077_v29  ;;  %v598_v25 = vadd.f32 %v4902_v10, %v4867_v59 }
 0x19e   : > { %v4927_v36 = vpop.f32.mrb[15].mxu1  ;;  %v4081_v37 = vpop.eup %4080  ;;  %4100 = vrcp.f32 %v996_v30  ;;  %v1002_v38 = vadd.f32 1.0, %v4079_v33  ;;  %v628_v33 = vadd.f32 %v4904_v11, %v4878_v0 }
 0x19f   : > { %v4930_v40 = vpop.f32.mrb[15].mxu0  ;;  %v4083_v41 = vpop.eup %4082  ;;  %4102 = vrcp.f32 %v1178_v34 }
 0x1a0   : > { %v4932_v43 = vpop.eup %4084  ;;  %4104 = vrcp.f32 %v1002_v38  ;;  %v4938_v48 = vpop.f32.mrb[16].mxu1 }
 0x1a1   : > { %v4935_v45 = vpop.eup %4086  ;;  %4106 = vpow2.f32 %v3297_v35  ;;  %v4940_v49 = vpop.f32.mrb[16].mxu0 }
 0x1a2   : > { %v4089_v46 = vpop.eup %4088  ;;  %4108 = vtanh.f32 %v594_v39  ;;  %v4942_v52 = vpop.f32.mrb[17].mxu1 }
 0x1a3   : > { %v4091_v50 = vpop.eup %4090  ;;  %v1184_v51 = vadd.f32 1.0, %v4089_v46  ;;  %4110 = vpow2.f32 %v3298_v42  ;;  %v4944_v54 = vpop.f32.mrb[17].mxu0 }
 0x1a4   : > { %v4093_v63 = vpop.eup %4092  ;;  %v1003_v2 = vadd.f32 1.0, %v4091_v50  ;;  %4112 = vtanh.f32 %v596_v44  ;;  %v4946_v3 = vpop.f32.mrb[18].mxu1 }
 0x1a5   : > { %v4948_v5 = vpop.f32.mrb[18].mxu0  ;;  %v4095_v8 = vpop.eup %4094  ;;  %4114 = vrcp.f32 %v1184_v51  ;;  %v1185_v6 = vadd.f32 1.0, %v4093_v63 }
 0x1a6   : > { %v4950_v9 = vpop.f32.mrb[19].mxu1  ;;  %v4097_v13 = vpop.eup %4096  ;;  %4116 = vrcp.f32 %v1003_v2  ;;  %v1261_v15 = vmul.f32 %v4095_v8, %v4081_v37  ;;  %v3305_v8 = vmul.f32 -1.442695, %v628_v33 }
 0x1a7   : > { %v4952_v19 = vpop.f32.mrb[19].mxu0  ;;  %v4099_v20 = vpop.eup %4098  ;;  %v1275_v21 = vmul.f32 %v4097_v13, %v4900_v7  ;;  %4118 = vrcp.f32 %v1185_v6 }
 0x1a8   : > { %v4101_v24 = vpop.eup %4100  ;;  %4120 = vtanh.f32 %v1261_v15  ;;  %v4962_v34 = vpop.f32.mrb[20].mxu1 }
 0x1a9   : > { %v4957_v26 = vpop.eup %4102  ;;  %4122 = vtanh.f32 %v1275_v21  ;;  %v1276_v29 = vmul.f32 %v4101_v24, %v4906_v12  ;;  %v4964_v35 = vpop.f32.mrb[20].mxu0  ;;  %v665_v12 = vadd.f32 %v4914_v22, %v4859_v55  ;;  %v667_v22 = vadd.f32 %v4919_v27, %v4859_v55 }
 0x1aa   : > { %v4105_v30 = vpop.eup %4104  ;;  %4124 = vpow2.f32 %v3304_v18  ;;  %v4967_v38 = vpop.f32.mrb[21].mxu1 }
 0x1ab   : > { %v4107_v7 = vpop.eup %4106  ;;  %4126 = vtanh.f32 %v1276_v29  ;;  %v1282_v37 = vmul.f32 %v4105_v30, %v4908_v14  ;;  %v4969_v10 = vpop.f32.mrb[21].mxu0  ;;  %v758_v14 = vadd.f32 %v4916_v23, %v4859_v55  ;;  %v3257_v15 = vmul.f32 -1.442695, %v665_v12 }
 0x1ac   : > { %v4109_v39 = vpop.eup %4108  ;;  %v1191_v42 = vadd.f32 1.0, %v4107_v7  ;;  %4128 = vtanh.f32 %v598_v25  ;;  %v4973_v44 = vpop.f32.mrb[22].mxu1  ;;  %v760_v23 = vadd.f32 %v4921_v28, %v4859_v55  ;;  %v3258_v27 = vmul.f32 -1.442695, %v667_v22 }
 0x1ad   : > { %v4975_v11 = vpop.f32.mrb[22].mxu0  ;;  %v4111_v46 = vpop.eup %4110  ;;  %4130 = vtanh.f32 %v1282_v37  ;;  %v1262_v47 = vmul.f32 %v4109_v39, %v4083_v41  ;;  %v3259_v24 = vmul.f32 -1.442695, %v758_v14  ;;  %v669_v29 = vadd.f32 %v4923_v31, %v4854_v53 }
 0x1ae   : > { %v4979_v50 = vpop.f32.mrb[23].mxu1  ;;  %v4981_v51 = vpop.f32.mrb[23].mxu0  ;;  %4132 = vrcp.f32 %v1191_v42  ;;  %v1192_v2 = vadd.f32 1.0, %v4111_v46  ;;  %v762_v28 = vadd.f32 %v4925_v32, %v4854_v53  ;;  %v3260_v42 = vmul.f32 -1.442695, %v760_v23 }
 0x1af   : > { %v4113_v63 = vpop.eup %4112  ;;  %4134 = vtanh.f32 %v1262_v47  ;;  %v671_v31 = vadd.f32 %v4927_v36, %v4854_v53  ;;  %v764_v32 = vadd.f32 %v4930_v40, %v4854_v53  ;;  %v675_v36 = vadd.f32 %v4938_v48, %v4869_v60 }
 0x1b0   : > { %v4985_v6 = vpop.eup %4114  ;;  %v1268_v13 = vmul.f32 %v4113_v63, %v4932_v43  ;;  %4136 = vrcp.f32 %v1192_v2  ;;  %v4995_v30 = vpop.f32.mrb[24].mxu1  ;;  %v768_v40 = vadd.f32 %v4940_v49, %v4869_v60 }
 0x1b1   : > { %v4117_v41 = vpop.eup %4116  ;;  %v4997_v43 = vpop.f32.mrb[24].mxu0  ;;  %v3265_v23 = vmul.f32 -1.442695, %v671_v31 }
 0x1b2   : > { %v4990_v18 = vpop.eup %4118  ;;  %v1283_v21 = vmul.f32 %v4117_v41, %v4911_v16  ;;  %4138 = vtanh.f32 %v1268_v13  ;;  %v5001_v7 = vpop.f32.mrb[25].mxu1  ;;  %v3266_v41 = vmul.f32 -1.442695, %v762_v28 }
 0x1b3   : > { %v4121_v25 = vpop.eup %4120  ;;  %4140 = vpow2.f32 %v3305_v8  ;;  %v5003_v16 = vpop.f32.mrb[25].mxu0  ;;  %v3264_v8 = vmul.f32 -1.442695, %v669_v29  ;;  %v3271_v29 = vmul.f32 -1.442695, %v675_v36 }
 0x1b4   : > { %v4123_v33 = vpop.eup %4122  ;;  %4142 = vtanh.f32 %v1283_v21  ;;  %v1317_v37 = vmul.f32 %v4121_v25, %v4099_v20  ;;  %v5007_v12 = vpop.f32.mrb[26].mxu1 }
 0x1b5   : > { %v4125_v39 = vpop.eup %4124  ;;  %4144 = vpow2.f32 %v3257_v15  ;;  %v5009_v46 = vpop.f32.mrb[26].mxu0 }
 0x1b6   : > { %v4127_v47 = vpop.eup %4126  ;;  %v1198_v14 = vadd.f32 1.0, %v4125_v39  ;;  %4146 = vpow2.f32 %v3259_v24  ;;  %v5013_v63 = vpop.f32.mrb[27].mxu1  ;;  %v3267_v24 = vmul.f32 -1.442695, %v764_v32  ;;  %v677_v32 = vadd.f32 %v4942_v52, %v4869_v60 }
 0x1b7   : > { %v5015_v2 = vpop.f32.mrb[27].mxu0  ;;  %v4129_v20 = vpop.eup %4128  ;;  %4148 = vpow2.f32 %v3258_v27 }
 0x1b8   : > { %v4131_v22 = vpop.eup %4130  ;;  %4150 = vrcp.f32 %v1198_v14  ;;  %v1269_v13 = vmul.f32 %v4129_v20, %v4935_v45  ;;  %v5023_v39 = vpop.f32.mrb[28].mxu1 }
 0x1b9   : > { %v4133_v15 = vpop.eup %4132  ;;  %4152 = vpow2.f32 %v3260_v42  ;;  %v5025_v14 = vpop.f32.mrb[28].mxu0 }
 0x1ba   : > { %v4135_v21 = vpop.eup %4134  ;;  %4154 = vtanh.f32 %v1269_v13  ;;  %v1331_v25 = vmul.f32 %v4133_v15, %v4123_v33  ;;  %v5027_v28 = vpop.f32.mrb[29].mxu1  ;;  %v3273_v33 = vmul.f32 -1.442695, %v768_v40  ;;  %v770_v15 = vadd.f32 %v4944_v54, %v4869_v60 }
 0x1bb   : > { %v4137_v27 = vpop.eup %4136  ;;  %4156 = vpow2.f32 %v3264_v8  ;;  %v1318_v48 = vmul.f32 %v4135_v21, %v4957_v26  ;;  %v5029_v42 = vpop.f32.mrb[29].mxu0  ;;  %v774_v60 = vadd.f32 %v4952_v19, %v4871_v61 }
 0x1bc   : > { %v4139_v45 = vpop.eup %4138  ;;  %4158 = vpow2.f32 %v3266_v41  ;;  %v5031_v49 = vmul.f32 %v4137_v27, %v4127_v47  ;;  %v5036_v20 = vpop.f32.mrb[30].mxu1  ;;  %v3274_v53 = vmul.f32 -1.442695, %v770_v15 }
 0x1bd   : > { %v4141_v31 = vpop.eup %4140  ;;  %4160 = vpow2.f32 %v3265_v23  ;;  %v1324_v26 = vmul.f32 %v4139_v45, %v4985_v6  ;;  %v5038_v8 = vpop.f32.mrb[30].mxu0  ;;  %v3272_v45 = vmul.f32 -1.442695, %v677_v32  ;;  %v679_v32 = vadd.f32 %v4946_v3, %v4871_v61 }
 0x1be   : > { %v5040_v36 = vpop.eup %4142  ;;  %v1199_v13 = vadd.f32 1.0, %v4141_v31  ;;  %4162 = vpow2.f32 %v3267_v24  ;;  %v5042_v41 = vpop.f32.mrb[31].mxu1 }
 0x1bf   : > { %v4145_v47 = vpop.eup %4144  ;;  %4164 = vpow2.f32 %v3271_v29  ;;  %v1345_v23 = vpack.c.bf16 %v1324_v26, %v1317_v37  ;;  %v5046_v40 = vpop.f32.mrb[31].mxu0 }
 0x1c0   : > { %v4147_v52 = vpop.eup %4146  ;;  %4166 = vrcp.f32 %v1199_v13  ;;  %v983_v6 = vadd.f32 1.0, %v4145_v47  ;;  %v5048_v55 = vpop.f32.mrb[32].mxu1 }
 0x1c1   : > { %v4149_v21 = vpop.eup %4148  ;;  %v985_v27 = vadd.f32 1.0, %v4147_v52  ;;  %4168 = vpow2.f32 %v3273_v33  ;;  %v5050_v54 = vpop.f32.mrb[32].mxu0 }
 0x1c2   : > { %v4151_v4 = vpop.eup %4150  ;;  %4170 = vrcp.f32 %v983_v6  ;;  %v984_v24 = vadd.f32 1.0, %v4149_v21  ;;  %v5052_v13 = vpop.f32.mrb[33].mxu1 }
 0x1c3   : > { %v4153_v31 = vpop.eup %4152  ;;  %4172 = vrcp.f32 %v985_v27  ;;  %v1338_v29 = vmul.f32 %v4151_v4, %v4131_v22  ;;  %v5054_v47 = vpop.f32.mrb[33].mxu0 }
 0x1c4   : > { %v4155_v37 = vpop.eup %4154  ;;  %4174 = vrcp.f32 %v984_v24  ;;  %v986_v26 = vadd.f32 1.0, %v4153_v31  ;;  %v5061_v4 = vpop.f32.mrb[34].mxu1 }
 0x1c5   : > { %v4157_v33 = vpop.eup %4156  ;;  %4176 = vpow2.f32 %v3272_v45  ;;  %v1325_v52 = vmul.f32 %v4155_v37, %v4990_v18  ;;  %v5059_v15 = vpack.c.bf16 %v1338_v29, %v1331_v25  ;;  %v5063_v22 = vpop.f32.mrb[34].mxu0  ;;  %v772_v45 = vadd.f32 %v4948_v5, %v4871_v61  ;;  %v3894_v18 = vld [vmem:[%s5891_s3 + $0x180] ss:$12 sps:$4 sm:$0xff]   ;;  %v3904_v25 = vld [vmem:[%s5891_s3 + $0x188] ss:$12 sps:$4 sm:$0xff]  }
 0x1c6   : > { %v4159_v6 = vpop.eup %4158  ;;  %4178 = vrcp.f32 %v986_v26  ;;  %v990_v21 = vadd.f32 1.0, %v4157_v33  ;;  %v5065_v27 = vpop.f32.mrb[35].mxu1  ;;  %v3899_v5 = vld [vmem:[%s5891_s3 + $0x19c] ss:$12 sps:$4 sm:$0xff]  }
 0x1c7   : > { %v4161_v24 = vpop.eup %4160  ;;  %v992_v31 = vadd.f32 1.0, %v4159_v6  ;;  %4180 = vpow2.f32 %v3274_v53  ;;  %v1346_v3 = vpack.c.bf16 %v1325_v52, %v1318_v48  ;;  %v5075_v29 = vpop.f32.mrb[35].mxu0  ;;  %v681_v53 = vadd.f32 %v4950_v9, %v4871_v61  ;;  %v3908_v48 = vld [vmem:[%s5891_s3 + $0x260] ss:$12 sps:$4 sm:$0xff]  }
 0x1c8   : > { %5910 = vst [vmem:[#allocation10_spill] sm:$0xff] %v5075_v29  ;;  %v4163_v37 = vpop.eup %4162  ;;  %4182 = vrcp.f32 %v990_v21  ;;  %v991_v26 = vadd.f32 1.0, %v4161_v24  ;;  %v3278_v6 = vmul.f32 -1.442695, %v679_v32  ;;  %v3280_v29 = vmul.f32 -1.442695, %v772_v45 }
 0x1c9   : > { %v4165_v33 = vpop.eup %4164  ;;  %4184 = vrcp.f32 %v992_v31  ;;  %v993_v52 = vadd.f32 1.0, %v4163_v37  ;;  %2511 = vmatprep.mubr.bf16.mxu0 %v1346_v3  ;;  %2723 = vmatprep.mubr.bf16.mxu1 %v1346_v3  ;;  %v3897_v31 = vld [vmem:[%s5891_s3 + $0x198] ss:$12 sps:$4 sm:$0xff]   ;;  %v5091_v37 = vpop.f32.mrb[36].mxu1 }
 0x1ca   : > { %v4167_v21 = vpop.eup %4166  ;;  %4186 = vrcp.f32 %v991_v26  ;;  %v997_v9 = vadd.f32 1.0, %v4165_v33  ;;  %2512 = vmatmul.mubr.bf16.vlgmr.msra.gmra.mrb[36].mxu0 %v1345_v23  ;;  %2724 = vmatmul.mubr.bf16.vlgmr.msra.gmra.mrb[48].mxu1 %v1345_v23  ;;  %v3279_v26 = vmul.f32 -1.442695, %v681_v53  ;;  %v3902_v23 = vld [vmem:[%s5891_s3 + $0x1b4] ss:$12 sps:$4 sm:$0xff]   ;;  %v5098_v45 = vpop.f32.mrb[37].mxu1 }
 0x1cb   : > { %v4169_v24 = vpop.eup %4168  ;;  %4188 = vrcp.f32 %v993_v52  ;;  %2533 = vmatpush1.bf16.msra.mxu0 %v3894_v18  ;;  %v1339_v32 = vmul.f32 %v4167_v21, %v5040_v36  ;;  %3522 = vmatpush3.bf16.msra.mxu1 %v3904_v25  ;;  %v3281_v36 = vmul.f32 -1.442695, %v774_v60  ;;  %v3909_v33 = vld [vmem:[%s5891_s3 + $0x1a0] ss:$12 sps:$4 sm:$0xff]   ;;  %v5106_v52 = vpop.f32.mrb[38].mxu1  ;;  %v685_v21 = vadd.f32 %v4962_v34, %v4865_v58 }
 0x1cc   : > { %v5093_v19 = vpop.eup %4170  ;;  %4190 = vrcp.f32 %v997_v9  ;;  %v999_v3 = vadd.f32 1.0, %v4169_v24  ;;  %2534 = vmatprep.subr.bf16.mxu0 %v3899_v5  ;;  %3523 = vmatprep.subr.bf16.mxu1 %v3908_v48  ;;  %v5110_v5 = vpop.f32.mrb[39].mxu1  ;;  %v3900_v60 = vld [vmem:[%s5891_s3 + $0x1b0] ss:$12 sps:$4 sm:$0xff]   ;;  %v3907_v34 = vld [vmem:[%s5891_s3 + $0x1cc] ss:$12 sps:$4 sm:$0xff]   ;;  %v778_v24 = vadd.f32 %v4964_v35, %v4865_v58 }
 0x1cd   : > { %v5100_v18 = vpop.eup %4172  ;;  %4192 = vpow2.f32 %v3278_v6  ;;  %v1353_v25 = vpack.c.bf16 %v1339_v32, %v5031_v49  ;;  %v3913_v49 = vld [vmem:[%s5891_s3 + $0x278] ss:$12 sps:$4 sm:$0xff]   ;;  %v3918_v35 = vld [vmem:[%s5891_s3 + $0x290] ss:$12 sps:$4 sm:$0xff]  }
 0x1ce   : > { %v5108_v53 = vpop.eup %4174  ;;  %4194 = vrcp.f32 %v999_v3 }
 0x1cf   : > { %v4177_v48 = vpop.eup %4176  ;;  %4196 = vpow2.f32 %v3280_v29  ;;  %2535 = vmatpush1.bf16.msra.mxu0 %v3897_v31  ;;  %2521 = vmatprep.mubr.bf16.mxu0 %v1353_v25  ;;  %v3914_v31 = vld [vmem:[%s5891_s3 + $0x1b8] ss:$12 sps:$4 sm:$0xff]  }
 0x1d0   : > { %v5120_v6 = vpop.eup %4178  ;;  %v998_v9 = vadd.f32 1.0, %v4177_v48  ;;  %4198 = vpow2.f32 %v3279_v26  ;;  %2731 = vmatprep.mubr.bf16.mxu1 %v1353_v25  ;;  %2536 = vmatprep.subr.bf16.mxu0 %v3902_v23  ;;  %v687_v26 = vadd.f32 %v4967_v38, %v4865_v58  ;;  %v3905_v25 = vld [vmem:[%s5891_s3 + $0x1c8] ss:$12 sps:$4 sm:$0xff]   ;;  %v5146_v38 = vpop.f32.mrb[40].mxu1  ;;  %v3912_v48 = vld [vmem:[%s5891_s3 + $0x1e4] ss:$12 sps:$4 sm:$0xff]  }
 0x1d1   : > { %v4181_v29 = vpop.eup %4180  ;;  %4200 = vpow2.f32 %v3281_v36  ;;  %3524 = vmatpush3.bf16.msra.mxu1 %v3909_v33  ;;  %v780_v36 = vadd.f32 %v4969_v10, %v4865_v58  ;;  %v5155_v10 = vpop.f32.mrb[41].mxu1 }
 0x1d2   : > { %v5130_v32 = vpop.eup %4182  ;;  %4202 = vrcp.f32 %v998_v9  ;;  %v1000_v3 = vadd.f32 1.0, %v4181_v29  ;;  %2522 = vmatmul.mubr.bf16.gmra.mrb[40].mxu0 %v5059_v15  ;;  %2732 = vmatmul.mubr.bf16.gmra.mrb[52].mxu1 %v5059_v15  ;;  %v689_v15 = vadd.f32 %v4973_v44, %v4867_v59  ;;  %v5164_v9 = vpop.f32.mrb[42].mxu1 }
 0x1d3   : > { %v5139_v23 = vpop.eup %4184  ;;  %4204 = vtanh.f32 %v685_v21  ;;  %2537 = vmatpush1.bf16.msra.mxu0 %v3900_v60  ;;  %3525 = vmatprep.subr.bf16.mxu1 %v3913_v49  ;;  %v782_v60 = vadd.f32 %v4975_v11, %v4867_v59  ;;  %v3919_v49 = vld [vmem:[%s5891_s3 + $0x1d0] ss:$12 sps:$4 sm:$0xff]   ;;  %5911 = vst [vmem:[#allocation11_spill] sm:$0xff] %v5164_v9  ;;  %v5171_v29 = vpop.f32.mrb[43].mxu1  ;;  %v691_v11 = vadd.f32 %v4979_v50, %v4867_v59  ;;  %v3924_v50 = vld [vmem:[%s5891_s3 + $0x1e8] ss:$12 sps:$4 sm:$0xff]  }
 0x1d4   : > { %v5148_v33 = vpop.eup %4186  ;;  %4206 = vrcp.f32 %v1000_v3  ;;  %2538 = vmatprep.subr.bf16.mxu0 %v3907_v34  ;;  %v3923_v34 = vld [vmem:[%s5891_s3 + $0x2a8] ss:$12 sps:$4 sm:$0xff]   ;;  %5912 = vst [vmem:[#allocation12_spill] sm:$0xff] %v5171_v29  ;;  %v784_v9 = vadd.f32 %v4981_v51, %v4867_v59  ;;  %v695_v51 = vadd.f32 %v4995_v30, %v4880_v1 }
 0x1d5   : > { %v5157_v21 = vpop.eup %4188  ;;  %4208 = vtanh.f32 %v778_v24  ;;  %3526 = vmatpush3.bf16.msra.mxu1 %v3914_v31  ;;  %v3910_v31 = vld [vmem:[%s5891_s3 + $0x1e0] ss:$12 sps:$4 sm:$0xff]  }
 0x1d6   : > { %v5166_v44 = vpop.eup %4190  ;;  %4210 = vtanh.f32 %v687_v26  ;;  %3527 = vmatprep.subr.bf16.mxu1 %v3918_v35  ;;  %v3917_v35 = vld [vmem:[%s5891_s3 + $0x1fc] ss:$12 sps:$4 sm:$0xff]  }
 0x1d7   : > { %v4193_v24 = vpop.eup %4192  ;;  %4212 = vtanh.f32 %v780_v36  ;;  %2539 = vmatpush1.bf16.msra.mxu0 %v3905_v25 }
 0x1d8   : > { %v5178_v3 = vpop.eup %4194  ;;  %v1004_v26 = vadd.f32 1.0, %v4193_v24  ;;  %4214 = vtanh.f32 %v689_v15  ;;  %2540 = vmatprep.subr.bf16.mxu0 %v3912_v48  ;;  %v3928_v15 = vld [vmem:[%s5891_s3 + $0x2c0] ss:$12 sps:$4 sm:$0xff]  }
 0x1d9   : > { %v4197_v29 = vpop.eup %4196  ;;  %4216 = vtanh.f32 %v782_v60  ;;  %3528 = vmatpush3.bf16.msra.mxu1 %v3919_v49  ;;  %v3915_v60 = vld [vmem:[%s5891_s3 + $0x1f8] ss:$12 sps:$4 sm:$0xff]   ;;  %v5194_v49 = vpop.f32.mrb[44].mxu1 }
 0x1da   : > { %v4199_v36 = vpop.eup %4198  ;;  %4218 = vrcp.f32 %v1004_v26  ;;  %v1006_v25 = vadd.f32 1.0, %v4197_v29  ;;  %3529 = vmatprep.subr.bf16.mxu1 %v3923_v34  ;;  %v3922_v29 = vld [vmem:[%s5891_s3 + $0x214] ss:$12 sps:$4 sm:$0xff]  }
 0x1db   : > { %v4201_v48 = vpop.eup %4200  ;;  %v1005_v24 = vadd.f32 1.0, %v4199_v36  ;;  %4220 = vtanh.f32 %v691_v11  ;;  %2541 = vmatpush1.bf16.msra.mxu0 %v3910_v31  ;;  %v5201_v11 = vpop.f32.mrb[45].mxu1  ;;  %v3929_v31 = vld [vmem:[%s5891_s3 + $0x200] ss:$12 sps:$4 sm:$0xff]  }
 0x1dc   : > { %v5196_v26 = vpop.eup %4202  ;;  %4222 = vrcp.f32 %v1006_v25  ;;  %v1007_v34 = vadd.f32 1.0, %v4201_v48  ;;  %2542 = vmatprep.subr.bf16.mxu0 %v3917_v35  ;;  %v5208_v59 = vpop.f32.mrb[46].mxu1  ;;  %v3933_v48 = vld [vmem:[%s5891_s3 + $0x2d8] ss:$12 sps:$4 sm:$0xff]  }
 0x1dd   : > { %v4205_v36 = vpop.eup %4204  ;;  %4224 = vrcp.f32 %v1005_v24  ;;  %3530 = vmatpush3.bf16.msra.mxu1 %v3924_v50  ;;  %5913 = vst [vmem:[#allocation13_spill] sm:$0xff] %v5208_v59  ;;  %v5216_v24 = vpop.f32.mrb[47].mxu1  ;;  %v3920_v50 = vld [vmem:[%s5891_s3 + $0x210] ss:$12 sps:$4 sm:$0xff]  }
 0x1de   : > { %v5210_v25 = vpop.eup %4206  ;;  %4226 = vrcp.f32 %v1007_v34  ;;  %v1263_v35 = vmul.f32 %v4205_v36, %v5093_v19  ;;  %3531 = vmatprep.subr.bf16.mxu1 %v3928_v15  ;;  %v3927_v19 = vld [vmem:[%s5891_s3 + $0x22c] ss:$12 sps:$4 sm:$0xff]  }
 0x1df   : > { %v4209_v30 = vpop.eup %4208  ;;  %4228 = vtanh.f32 %v784_v9  ;;  %2543 = vmatpush1.bf16.msra.mxu0 %v3915_v60  ;;  %v3934_v9 = vld [vmem:[%s5891_s3 + $0x218] ss:$12 sps:$4 sm:$0xff]  }
 0x1e0   : > { %v4211_v59 = vpop.eup %4210  ;;  %4230 = vtanh.f32 %v1263_v35  ;;  %v1265_v34 = vmul.f32 %v4209_v30, %v5100_v18  ;;  %2544 = vmatprep.subr.bf16.mxu0 %v3922_v29  ;;  %v3938_v18 = vld [vmem:[%s5891_s3 + $0x2f0] ss:$12 sps:$4 sm:$0xff]  }
 0x1e1   : > { %v4213_v15 = vpop.eup %4212  ;;  %v1264_v36 = vmul.f32 %v4211_v59, %v5108_v53  ;;  %4232 = vtanh.f32 %v695_v51  ;;  %3532 = vmatpush3.bf16.msra.mxu1 %v3929_v31  ;;  %v788_v59 = vadd.f32 %v4997_v43, %v4880_v1  ;;  %v3925_v53 = vld [vmem:[%s5891_s3 + $0x228] ss:$12 sps:$4 sm:$0xff]   ;;  %v3932_v31 = vld [vmem:[%s5891_s3 + $0x244] ss:$12 sps:$4 sm:$0xff]   ;;  %v697_v43 = vadd.f32 %v5001_v7, %v4880_v1 }
 0x1e2   : > { %v4215_v60 = vpop.eup %4214  ;;  %4234 = vtanh.f32 %v1265_v34  ;;  %v1266_v35 = vmul.f32 %v4213_v15, %v5120_v6  ;;  %3533 = vmatprep.subr.bf16.mxu1 %v3933_v48  ;;  %v790_v34 = vadd.f32 %v5003_v16, %v4880_v1  ;;  %v699_v7 = vadd.f32 %v5007_v12, %v4886_v17  ;;  %v3937_v16 = vld [vmem:[%s5891_s3 + $0x25c] ss:$12 sps:$4 sm:$0xff]  }
 0x1e3   : > { %v4217_v29 = vpop.eup %4216  ;;  %4236 = vtanh.f32 %v1264_v36  ;;  %v1270_v30 = vmul.f32 %v4215_v60, %v5130_v32  ;;  %2545 = vmatpush1.bf16.msra.mxu0 %v3920_v50  ;;  %v3939_v32 = vld [vmem:[%s5891_s3 + $0x230] ss:$12 sps:$4 sm:$0xff]   ;;  %v3930_v36 = vld [vmem:[%s5891_s3 + $0x240] ss:$12 sps:$4 sm:$0xff]   ;;  %v792_v60 = vadd.f32 %v5009_v46, %v4886_v17  ;;  %v705_v12 = vadd.f32 %v5023_v39, %v4861_v56  ;;  %v3935_v39 = vld [vmem:[%s5891_s3 + $0x258] ss:$12 sps:$4 sm:$0xff]  }
 0x1e4   : > { %v5239_v51 = vpop.eup %4218  ;;  %4238 = vtanh.f32 %v1266_v35  ;;  %v1272_v6 = vmul.f32 %v4217_v29, %v5139_v23  ;;  %2546 = vmatprep.subr.bf16.mxu0 %v3927_v19  ;;  %v3943_v19 = vld [vmem:[%s5891_s3 + $0x3c8] ss:$12 sps:$4 sm:$0xff]   ;;  %v798_v29 = vadd.f32 %v5025_v14, %v4861_v56  ;;  %v707_v46 = vadd.f32 %v5027_v28, %v4861_v56 }
 0x1e5   : > { %v4221_v48 = vpop.eup %4220  ;;  %4240 = vtanh.f32 %v1270_v30  ;;  %3534 = vmatpush3.bf16.msra.mxu1 %v3934_v9  ;;  %v794_v14 = vadd.f32 %v5015_v2, %v4886_v17  ;;  %v3285_v28 = vmul.f32 -1.442695, %v705_v12  ;;  %v3945_v12 = vld [vmem:[%s5891_s3 + $0x288] ss:$12 sps:$4 sm:$0xff]  }
 0x1e6   : > { %v5250_v50 = vpop.eup %4222  ;;  %4242 = vtanh.f32 %v1272_v6  ;;  %v1271_v23 = vmul.f32 %v4221_v48, %v5148_v33  ;;  %3535 = vmatprep.subr.bf16.mxu1 %v3938_v18  ;;  %v3286_v2 = vmul.f32 -1.442695, %v707_v46 }
 0x1e7   : > { %v5258_v15 = vpop.eup %4224  ;;  %4244 = vtanh.f32 %v788_v59  ;;  %2547 = vmatpush1.bf16.msra.mxu0 %v3925_v53  ;;  %v701_v59 = vadd.f32 %v5013_v63, %v4886_v17  ;;  %v3942_v63 = vld [vmem:[%s5891_s3 + $0x274] ss:$12 sps:$4 sm:$0xff]  }
 0x1e8   : > { %v5265_v33 = vpop.eup %4226  ;;  %4246 = vtanh.f32 %v1271_v23  ;;  %2548 = vmatprep.subr.bf16.mxu0 %v3932_v31  ;;  %v800_v31 = vadd.f32 %v5029_v42, %v4861_v56  ;;  %v3947_v42 = vld [vmem:[%s5891_s3 + $0x28c] ss:$12 sps:$4 sm:$0xff]  }
 0x1e9   : > { %v4229_v9 = vpop.eup %4228  ;;  %4248 = vtanh.f32 %v697_v43  ;;  %3536 = vmatpush3.bf16.msra.mxu1 %v3939_v32  ;;  %v3287_v43 = vmul.f32 -1.442695, %v798_v29  ;;  %v3940_v32 = vld [vmem:[%s5891_s3 + $0x270] ss:$12 sps:$4 sm:$0xff]  }
 0x1ea   : > { %v5274_v35 = vpop.eup %4230  ;;  %v1273_v18 = vmul.f32 %v4229_v9, %v5157_v21  ;;  %4250 = vtanh.f32 %v790_v34  ;;  %3549 = vmatprep.subr.bf16.mxu1 %v3943_v19  ;;  %v3288_v19 = vmul.f32 -1.442695, %v800_v31 }
 0x1eb   : > { %v4233_v30 = vpop.eup %4232  ;;  %4252 = vtanh.f32 %v699_v7  ;;  %2549 = vmatpush1.bf16.msra.mxu0 %v3930_v36  ;;  %v709_v7 = vadd.f32 %v5036_v20, %v4863_v57  ;;  %v3952_v20 = vld [vmem:[%s5891_s3 + $0x2a4] ss:$12 sps:$4 sm:$0xff]  }
 0x1ec   : > { %v5286_v53 = vpop.eup %4234  ;;  %4254 = vtanh.f32 %v1273_v18  ;;  %v1277_v21 = vmul.f32 %v4233_v30, %v5166_v44  ;;  %2550 = vmatprep.subr.bf16.mxu0 %v3937_v16 }
 0x1ed   : > { %v5294_v6 = vpop.eup %4236  ;;  %4256 = vtanh.f32 %v792_v60  ;;  %v802_v60 = vadd.f32 %v5038_v8, %v4863_v57 }
 0x1ee   : > { %v5298_v48 = vpop.eup %4238  ;;  %4258 = vtanh.f32 %v1277_v21 }
 0x1ef   : > { %v5300_v44 = vpop.eup %4240  ;;  %4260 = vtanh.f32 %v701_v59  ;;  %2551 = vmatpush1.bf16.msra.mxu0 %v3935_v39  ;;  %v3292_v59 = vmul.f32 -1.442695, %v709_v7  ;;  %v3294_v21 = vmul.f32 -1.442695, %v802_v60 }
 0x1f0   : > { %v5305_v23 = vpop.eup %4242  ;;  %4262 = vtanh.f32 %v794_v14  ;;  %2552 = vmatprep.subr.bf16.mxu0 %v3942_v63  ;;  %v3957_v63 = vld [vmem:[%s5891_s3 + $0x2bc] ss:$12 sps:$4 sm:$0xff]  }
 0x1f1   : > { %v4245_v34 = vpop.eup %4244  ;;  %4264 = vpow2.f32 %v3285_v28 }
 0x1f2   : > { %v5312_v36 = vpop.eup %4246  ;;  %v1279_v16 = vmul.f32 %v4245_v34, %v5178_v3  ;;  %4266 = vpow2.f32 %v3287_v43 }
 0x1f3   : > { %v4249_v9 = vpop.eup %4248  ;;  %4268 = vpow2.f32 %v3286_v2  ;;  %2553 = vmatpush1.bf16.msra.mxu0 %v3940_v32 }
 0x1f4   : > { %v4251_v18 = vpop.eup %4250  ;;  %4270 = vtanh.f32 %v1279_v16  ;;  %v1278_v29 = vmul.f32 %v4249_v9, %v5196_v26  ;;  %2554 = vmatprep.subr.bf16.mxu0 %v3947_v42  ;;  %v3950_v26 = vld [vmem:[%s5891_s3 + $0x2a0] ss:$12 sps:$4 sm:$0xff]   ;;  %v3955_v42 = vld [vmem:[%s5891_s3 + $0x2b8] ss:$12 sps:$4 sm:$0xff]   ;;  %v808_v16 = vadd.f32 %v5050_v54, %v4873_v62 }
 0x1f5   : > { %v4253_v3 = vpop.eup %4252  ;;  %v1280_v30 = vmul.f32 %v4251_v18, %v5210_v25  ;;  %4272 = vpow2.f32 %v3288_v19 }
 0x1f6   : > { %v5325_v8 = vpop.eup %4254  ;;  %4274 = vtanh.f32 %v1278_v29  ;;  %v1284_v46 = vmul.f32 %v4253_v3, %v5239_v51  ;;  %v711_v51 = vadd.f32 %v5042_v41, %v4863_v57  ;;  %v715_v41 = vadd.f32 %v5048_v55, %v4873_v62  ;;  %v3960_v29 = vld [vmem:[%s5891_s3 + $0x2d0] ss:$12 sps:$4 sm:$0xff]  }
 0x1f7   : > { %v4257_v39 = vpop.eup %4256  ;;  %4276 = vtanh.f32 %v1280_v30  ;;  %2555 = vmatpush1.bf16.msra.mxu0 %v3945_v12  ;;  %v717_v55 = vadd.f32 %v5052_v13, %v4873_v62  ;;  %v3967_v30 = vld [vmem:[%s5891_s3 + $0x2ec] ss:$12 sps:$4 sm:$0xff]   ;;  %v810_v13 = vadd.f32 %v5054_v47, %v4873_v62 }
 0x1f8   : > { %v5331_v14 = vpop.eup %4258  ;;  %4278 = vtanh.f32 %v1284_v46  ;;  %v1286_v25 = vmul.f32 %v4257_v39, %v5250_v50  ;;  %2556 = vmatprep.subr.bf16.mxu0 %v3952_v20  ;;  %v804_v50 = vadd.f32 %v5046_v40, %v4863_v57  ;;  %v3293_v40 = vmul.f32 -1.442695, %v711_v51 }
 0x1f9   : > { %v4261_v28 = vpop.eup %4260  ;;  %4280 = vpow2.f32 %v3292_v59  ;;  %v3299_v54 = vmul.f32 -1.442695, %v715_v41  ;;  %v3301_v46 = vmul.f32 -1.442695, %v808_v16  ;;  %v5915_v41 = vld [vmem:[#allocation9_spill] sm:$0xff] }
 0x1fa   : > { %v4263_v31 = vpop.eup %4262  ;;  %4282 = vtanh.f32 %v1286_v25  ;;  %v1285_v43 = vmul.f32 %v4261_v28, %v5258_v15  ;;  %v3962_v15 = vld [vmem:[%s5891_s3 + $0x2d4] ss:$12 sps:$4 sm:$0xff]   ;;  %v3295_v18 = vmul.f32 -1.442695, %v804_v50  ;;  %v3300_v25 = vmul.f32 -1.442695, %v717_v55 }
 0x1fb   : > { %v4265_v2 = vpop.eup %4264  ;;  %v1287_v32 = vmul.f32 %v4263_v31, %v5265_v33  ;;  %4284 = vpow2.f32 %v3294_v21  ;;  %2557 = vmatpush1.bf16.msra.mxu0 %v3950_v26  ;;  %v719_v21 = vadd.f32 %v5061_v4, %v4878_v0  ;;  %v3965_v28 = vld [vmem:[%s5891_s3 + $0x2e8] ss:$12 sps:$4 sm:$0xff]   ;;  %v721_v31 = vadd.f32 %v5065_v27, %v4878_v0  ;;  %v3972_v4 = vld [vmem:[%s5891_s3 + $0x304] ss:$12 sps:$4 sm:$0xff]  }
 0x1fc   : > { %v4267_v34 = vpop.eup %4266  ;;  %4286 = vtanh.f32 %v1285_v43  ;;  %v1179_v19 = vadd.f32 1.0, %v4265_v2  ;;  %2558 = vmatprep.subr.bf16.mxu0 %v3957_v63  ;;  %v812_v63 = vadd.f32 %v5063_v22, %v4878_v0  ;;  %v3302_v22 = vmul.f32 -1.442695, %v810_v13  ;;  %v5914_v2 = vld [vmem:[#allocation10_spill] sm:$0xff] }
 0x1fd   : > { %v4269_v33 = vpop.eup %4268  ;;  %4288 = vtanh.f32 %v1287_v32  ;;  %v1181_v7 = vadd.f32 1.0, %v4267_v34  ;;  %v814_v32 = vadd.f32 %v5914_v2, %v4878_v0  ;;  %v3306_v34 = vmul.f32 -1.442695, %v719_v21 }
 0x1fe   : > { %v5353_v9 = vpop.eup %4270  ;;  %4290 = vrcp.f32 %v1179_v19  ;;  %v1180_v60 = vadd.f32 1.0, %v4269_v33  ;;  %v3308_v27 = vmul.f32 -1.442695, %v812_v63 }
 0x1ff   : > { %v4273_v12 = vpop.eup %4272  ;;  %4292 = vrcp.f32 %v1181_v7  ;;  %2559 = vmatpush1.bf16.msra.mxu0 %v3955_v42  ;;  %v3307_v7 = vmul.f32 -1.442695, %v721_v31  ;;  %v3309_v16 = vmul.f32 -1.442695, %v814_v32 }
 0x200   : > { %v5360_v20 = vpop.eup %4274  ;;  %4294 = vrcp.f32 %v1180_v60  ;;  %v1182_v3 = vadd.f32 1.0, %v4273_v12  ;;  %2560 = vmatprep.subr.bf16.mxu0 %v3962_v15  ;;  %v859_v15 = vadd.f32 %v5091_v37, %v5915_v41 }
 0x201   : > { %v5365_v59 = vpop.eup %4276  ;;  %4296 = vpow2.f32 %v3293_v40 }
 0x202   : > { %v5369_v39 = vpop.eup %4278  ;;  %4298 = vrcp.f32 %v1182_v3  ;;  %v5916_v3 = vld [vmem:[#allocation7_spill] sm:$0xff] }
 0x203   : > { %v4281_v26 = vpop.eup %4280  ;;  %4300 = vpow2.f32 %v3295_v18  ;;  %2561 = vmatpush1.bf16.msra.mxu0 %v3960_v29  ;;  %v3275_v29 = vmul.f32 -1.442695, %v859_v15  ;;  %v851_v37 = vadd.f32 %v5098_v45, %v5916_v3  ;;  %v867_v3 = vadd.f32 %v5155_v10, %v4865_v58  ;;  %v5918_v58 = vld [vmem:[#allocation11_spill] sm:$0xff] }
 0x204   : > { %v5378_v51 = vpop.eup %4282  ;;  %v1186_v47 = vadd.f32 1.0, %v4281_v26  ;;  %4302 = vpow2.f32 %v3299_v54  ;;  %2562 = vmatprep.subr.bf16.mxu0 %v3967_v30  ;;  %v878_v10 = vadd.f32 %v5918_v58, %v4886_v17 }
 0x205   : > { %v4285_v43 = vpop.eup %4284  ;;  %4304 = vpow2.f32 %v3301_v46  ;;  %v3261_v45 = vmul.f32 -1.442695, %v851_v37 }
 0x206   : > { %v5387_v50 = vpop.eup %4286  ;;  %4306 = vrcp.f32 %v1186_v47  ;;  %v1188_v42 = vadd.f32 1.0, %v4285_v43 }
 0x207   : > { %v5389_v19 = vpop.eup %4288  ;;  %4308 = vpow2.f32 %v3300_v25  ;;  %2563 = vmatpush1.bf16.msra.mxu0 %v3965_v28 }
 0x208   : > { %v4291_v33 = vpop.eup %4290  ;;  %4310 = vrcp.f32 %v1188_v42  ;;  %2585 = vmatprep.subr.bf16.mxu0 %v3972_v4 }
 0x209   : > { %v4293_v40 = vpop.eup %4292  ;;  %4312 = vpow2.f32 %v3302_v22  ;;  %v1319_v60 = vmul.f32 %v4291_v33, %v5274_v35  ;;  %v862_v35 = vadd.f32 %v5106_v52, %v4871_v61 }
 0x20a   : > { %v4295_v12 = vpop.eup %4294  ;;  %4314 = vpow2.f32 %v3306_v34  ;;  %v1321_v18 = vmul.f32 %v4293_v40, %v5286_v53 }
 0x20b   : > { %v4297_v55 = vpop.eup %4296  ;;  %4316 = vpow2.f32 %v3308_v27  ;;  %v1320_v54 = vmul.f32 %v4295_v12, %v5294_v6  ;;  %v3282_v31 = vmul.f32 -1.442695, %v862_v35  ;;  %v883_v35 = vadd.f32 %v5201_v11, %v4861_v56 }
 0x20c   : > { %v4299_v30 = vpop.eup %4298  ;;  %v1187_v46 = vadd.f32 1.0, %v4297_v55  ;;  %4318 = vpow2.f32 %v3307_v7 }
 0x20d   : > { %v4301_v13 = vpop.eup %4300  ;;  %4320 = vpow2.f32 %v3309_v16  ;;  %v5401_v21 = vmul.f32 %v4299_v30, %v5298_v48  ;;  %v5917_v48 = vld [vmem:[#allocation6_spill] sm:$0xff]  ;;  %v891_v30 = vadd.f32 %v5194_v49, %v4873_v62  ;;  %v3948_v62 = vld [vmem:[%s5891_s3 + $0x3e0] ss:$12 sps:$4 sm:$0xff]  }
 0x20e   : > { %v4303_v53 = vpop.eup %4302  ;;  %4322 = vrcp.f32 %v1187_v46  ;;  %v1189_v26 = vadd.f32 1.0, %v4301_v13  ;;  %v854_v22 = vadd.f32 %v5110_v5, %v5917_v48  ;;  %v3944_v13 = vld [vmem:[%s5891_s3 + $0x308] ss:$12 sps:$4 sm:$0xff]  }
 0x20f   : > { %v4305_v25 = vpop.eup %4304  ;;  %v1193_v63 = vadd.f32 1.0, %v4303_v53  ;;  %4324 = vpow2.f32 %v3275_v29  ;;  %v5919_v53 = vld [vmem:[#allocation13_spill] sm:$0xff] }
 0x210   : > { %v4307_v28 = vpop.eup %4306  ;;  %4326 = vrcp.f32 %v1189_v26  ;;  %v1195_v6 = vadd.f32 1.0, %v4305_v25  ;;  %v3268_v16 = vmul.f32 -1.442695, %v854_v22  ;;  %v894_v26 = vadd.f32 %v5919_v53, %v4878_v0  ;;  %v5920_v22 = vld [vmem:[#allocation8_spill] sm:$0xff] }
 0x211   : > { %v4309_v47 = vpop.eup %4308  ;;  %4328 = vrcp.f32 %v1193_v63  ;;  %v1326_v4 = vmul.f32 %v4307_v28, %v5300_v44  ;;  %v3949_v63 = vld [vmem:[%s5891_s3 + $0x320] ss:$12 sps:$4 sm:$0xff]   ;;  %v3303_v0 = vmul.f32 -1.442695, %v891_v30 }
 0x212   : > { %v4311_v43 = vpop.eup %4310  ;;  %4330 = vrcp.f32 %v1195_v6  ;;  %v1194_v61 = vadd.f32 1.0, %v4309_v47  ;;  %v3289_v6 = vmul.f32 -1.442695, %v883_v35  ;;  %v3982_v47 = vld [vmem:[%s5891_s3 + $0x334] ss:$12 sps:$4 sm:$0xff]  }
 0x213   : > { %v4313_v52 = vpop.eup %4312  ;;  %4332 = vpow2.f32 %v3261_v45  ;;  %v1347_v2 = vpack.c.bf16 %v1326_v4, %v1319_v60  ;;  %v1328_v32 = vmul.f32 %v4311_v43, %v5305_v23  ;;  %v875_v23 = vadd.f32 %v5146_v38, %v4880_v1  ;;  %v3970_v38 = vld [vmem:[%s5891_s3 + $0x300] ss:$12 sps:$4 sm:$0xff]  }
 0x214   : > { %v4315_v42 = vpop.eup %4314  ;;  %4334 = vrcp.f32 %v1194_v61  ;;  %v1196_v34 = vadd.f32 1.0, %v4313_v52  ;;  %v3969_v53 = vld [vmem:[%s5891_s3 + $0x380] ss:$12 sps:$4 sm:$0xff]  }
 0x215   : > { %v4317_v27 = vpop.eup %4316  ;;  %v1200_v41 = vadd.f32 1.0, %v4315_v42  ;;  %4336 = vpow2.f32 %v3282_v31  ;;  %v5407_v15 = vpack.c.bf16 %v1328_v32, %v1321_v18  ;;  %v3310_v31 = vmul.f32 -1.442695, %v894_v26  ;;  %v3954_v42 = vld [vmem:[%s5891_s3 + $0x338] ss:$12 sps:$4 sm:$0xff]  }
 0x216   : > { %v4319_v44 = vpop.eup %4318  ;;  %4338 = vrcp.f32 %v1196_v34  ;;  %v1202_v33 = vadd.f32 1.0, %v4317_v27 }
 0x217   : > { %v4321_v7 = vpop.eup %4320  ;;  %4340 = vrcp.f32 %v1200_v41  ;;  %v1201_v40 = vadd.f32 1.0, %v4319_v44  ;;  %v3958_v44 = vld [vmem:[%s5891_s3 + $0x410] ss:$12 sps:$4 sm:$0xff]  }
 0x218   : > { %v4323_v12 = vpop.eup %4322  ;;  %4342 = vrcp.f32 %v1202_v33  ;;  %v1203_v5 = vadd.f32 1.0, %v4321_v7 }
 0x219   : > { %v4325_v60 = vpop.eup %4324  ;;  %4344 = vrcp.f32 %v1201_v40  ;;  %v1327_v55 = vmul.f32 %v4323_v12, %v5312_v36 }
 0x21a   : > { %v4327_v29 = vpop.eup %4326  ;;  %4346 = vrcp.f32 %v1203_v5  ;;  %v1001_v18 = vadd.f32 1.0, %v4325_v60 }
 0x21b   : > { %v4329_v37 = vpop.eup %4328  ;;  %4348 = vpow2.f32 %v3268_v16  ;;  %v1348_v46 = vpack.c.bf16 %v1327_v55, %v1320_v54  ;;  %v1329_v1 = vmul.f32 %v4327_v29, %v5325_v8  ;;  %v3977_v8 = vld [vmem:[%s5891_s3 + $0x31c] ss:$12 sps:$4 sm:$0xff]   ;;  %v3986_v55 = vld [vmem:[%s5891_s3 + $0x34c] ss:$12 sps:$4 sm:$0xff]  }
 0x21c   : > { %v4331_v36 = vpop.eup %4330  ;;  %4350 = vrcp.f32 %v1001_v18  ;;  %v1333_v49 = vmul.f32 %v4329_v37, %v5331_v14  ;;  %v886_v14 = vadd.f32 %v5216_v24, %v4863_v57  ;;  %v3975_v57 = vld [vmem:[%s5891_s3 + $0x318] ss:$12 sps:$4 sm:$0xff]   ;;  %v3984_v18 = vld [vmem:[%s5891_s3 + $0x348] ss:$12 sps:$4 sm:$0xff]  }
 0x21d   : > { %v4333_v54 = vpop.eup %4332  ;;  %4352 = vtanh.f32 %v875_v23  ;;  %2564 = vmatprep.mubr.bf16.mxu0 %v1348_v46  ;;  %2772 = vmatprep.mubr.bf16.mxu1 %v1348_v46  ;;  %v5437_v17 = vpack.c.bf16 %v1329_v1, %v5401_v21  ;;  %v1335_v56 = vmul.f32 %v4331_v36, %v5353_v9  ;;  %v3953_v9 = vld [vmem:[%s5891_s3 + $0x3f8] ss:$12 sps:$4 sm:$0xff]  }
 0x21e   : > { %v4335_v11 = vpop.eup %4334  ;;  %v987_v25 = vadd.f32 1.0, %v4333_v54  ;;  %2773 = vmatmul.mubr.bf16.vlgmr.msra.gmra.mrb[56].mxu1 %v1347_v2  ;;  %2565 = vmatmul.mubr.bf16.vlgmr.msra.gmra.mrb[36].mxu0 %v1347_v2  ;;  %4354 = vtanh.f32 %v867_v3  ;;  %v3296_v61 = vmul.f32 -1.442695, %v886_v14  ;;  %v5921_v2 = vld [vmem:[#allocation12_spill] sm:$0xff] }
 0x21f   : > { %v4337_v45 = vpop.eup %4336  ;;  %3550 = vmatpush3.bf16.msra.mxu1 %v3944_v13  ;;  %v1334_v21 = vmul.f32 %v4335_v11, %v5360_v20  ;;  %2586 = vmatpush1.bf16.msra.mxu0 %v3970_v38  ;;  %v870_v32 = vadd.f32 %v5921_v2, %v5920_v22  ;;  %v3990_v37 = vld [vmem:[%s5891_s3 + $0x364] ss:$12 sps:$4 sm:$0xff]   ;;  %v3964_v13 = vld [vmem:[%s5891_s3 + $0x368] ss:$12 sps:$4 sm:$0xff]   ;;  %v3968_v38 = vld [vmem:[%s5891_s3 + $0x440] ss:$12 sps:$4 sm:$0xff]  }
 0x220   : > { %v4339_v24 = vpop.eup %4338  ;;  %4356 = vrcp.f32 %v987_v25  ;;  %v1008_v28 = vadd.f32 1.0, %v4337_v45  ;;  %3551 = vmatprep.subr.bf16.mxu1 %v3948_v62  ;;  %2587 = vmatprep.subr.bf16.mxu0 %v3977_v8  ;;  %v3992_v14 = vld [vmem:[%s5891_s3 + $0x378] ss:$12 sps:$4 sm:$0xff]   ;;  %v3998_v45 = vld [vmem:[%s5891_s3 + $0x394] ss:$12 sps:$4 sm:$0xff]  }
 0x221   : > { %v4341_v20 = vpop.eup %4340  ;;  %4358 = vtanh.f32 %v878_v10  ;;  %v1336_v4 = vmul.f32 %v4339_v24, %v5365_v59  ;;  %v3980_v59 = vld [vmem:[%s5891_s3 + $0x330] ss:$12 sps:$4 sm:$0xff]   ;;  %v3988_v10 = vld [vmem:[%s5891_s3 + $0x360] ss:$12 sps:$4 sm:$0xff]  }
 0x222   : > { %v4343_v43 = vpop.eup %4342  ;;  %4360 = vrcp.f32 %v1008_v28  ;;  %v1340_v52 = vmul.f32 %v4341_v20, %v5369_v39  ;;  %v4002_v24 = vld [vmem:[%s5891_s3 + $0x3ac] ss:$12 sps:$4 sm:$0xff]   ;;  %v3983_v20 = vld [vmem:[%s5891_s3 + $0x488] ss:$12 sps:$4 sm:$0xff]  }
 0x223   : > { %v4345_v48 = vpop.eup %4344  ;;  %4362 = vpow2.f32 %v3303_v0  ;;  %3552 = vmatpush3.bf16.msra.mxu1 %v3949_v63  ;;  %2588 = vmatpush1.bf16.msra.mxu0 %v3975_v57  ;;  %v1342_v34 = vmul.f32 %v4343_v43, %v5378_v51  ;;  %v3996_v57 = vld [vmem:[%s5891_s3 + $0x390] ss:$12 sps:$4 sm:$0xff]   ;;  %v3987_v2 = vld [vmem:[%s5891_s3 + $0x4a0] ss:$12 sps:$4 sm:$0xff]  }
 0x224   : > { %v4347_v27 = vpop.eup %4346  ;;  %4364 = vpow2.f32 %v3289_v6  ;;  %v1341_v39 = vmul.f32 %v4345_v48, %v5387_v50  ;;  %3553 = vmatprep.subr.bf16.mxu1 %v3953_v9  ;;  %v1354_v41 = vpack.c.bf16 %v1340_v52, %v1333_v49  ;;  %2589 = vmatprep.subr.bf16.mxu0 %v3982_v47  ;;  %v3959_v50 = vld [vmem:[%s5891_s3 + $0x350] ss:$12 sps:$4 sm:$0xff]  }
 0x225   : > { %v4349_v33 = vpop.eup %4348  ;;  %4366 = vpow2.f32 %v3310_v31  ;;  %v1343_v7 = vmul.f32 %v4347_v27, %v5389_v19  ;;  %v5471_v40 = vpack.c.bf16 %v1342_v34, %v1335_v56  ;;  %v3963_v19 = vld [vmem:[%s5891_s3 + $0x428] ss:$12 sps:$4 sm:$0xff]   ;;  %v3973_v56 = vld [vmem:[%s5891_s3 + $0x458] ss:$12 sps:$4 sm:$0xff]   ;;  %v3978_v9 = vld [vmem:[%s5891_s3 + $0x470] ss:$12 sps:$4 sm:$0xff]  }
 0x226   : > { %v4351_v16 = vpop.eup %4350  ;;  %v994_v12 = vadd.f32 1.0, %v4349_v33  ;;  %4368 = vpow2.f32 %v3296_v61  ;;  %v1355_v51 = vpack.c.bf16 %v1341_v39, %v1334_v21  ;;  %v3994_v49 = vld [vmem:[%s5891_s3 + $0x37c] ss:$12 sps:$4 sm:$0xff]   ;;  %v3974_v21 = vld [vmem:[%s5891_s3 + $0x398] ss:$12 sps:$4 sm:$0xff]  }
 0x227   : > { %v4353_v5 = vpop.eup %4352  ;;  %4370 = vtanh.f32 %v870_v32  ;;  %3554 = vmatpush3.bf16.msra.mxu1 %v3954_v42  ;;  %2590 = vmatpush1.bf16.msra.mxu0 %v3980_v59  ;;  %v5476_v60 = vpack.c.bf16 %v1343_v7, %v1336_v4  ;;  %v3979_v6 = vld [vmem:[%s5891_s3 + $0x3b0] ss:$12 sps:$4 sm:$0xff]   ;;  %v4000_v4 = vld [vmem:[%s5891_s3 + $0x3a8] ss:$12 sps:$4 sm:$0xff]   ;;  %v4004_v59 = vld [vmem:[%s5891_s3 + $0x3c0] ss:$12 sps:$4 sm:$0xff]  }
 0x228   : > { %4372 = vrcp.f32 %v994_v12  ;;  %v1281_v23 = vmul.f32 %v4353_v5, %v4351_v16  ;;  %2780 = vmatprep.mubr.bf16.mxu1 %v1355_v51  ;;  %3555 = vmatprep.subr.bf16.mxu1 %v3958_v44  ;;  %v4355_v29 = vpop.eup %4354  ;;  %v4006_v61 = vld [vmem:[%s5891_s3 + $0x3c4] ss:$12 sps:$4 sm:$0xff]   ;;  %v4010_v27 = vld [vmem:[%s5891_s3 + $0x3dc] ss:$12 sps:$4 sm:$0xff]   ;;  %v4014_v12 = vld [vmem:[%s5891_s3 + $0x3f4] ss:$12 sps:$4 sm:$0xff]  }
 0x229   : > { %2781 = vmatmul.mubr.bf16.gmra.mrb[60].mxu1 %v1354_v41  ;;  %2574 = vmatprep.mubr.bf16.mxu0 %v1355_v51  ;;  %v3991_v44 = vld [vmem:[%s5891_s3 + $0x4b8] ss:$12 sps:$4 sm:$0xff]   ;;  %v3995_v51 = vld [vmem:[%s5891_s3 + $0x4d0] ss:$12 sps:$4 sm:$0xff]  }
 0x22a   : > { %v4357_v3 = vpop.eup %4356  ;;  %2821 = vmatprep.mubr.bf16.mxu1 %v5437_v17  ;;  %2575 = vmatmul.mubr.bf16.gmra.mrb[40].mxu0 %v1354_v41  ;;  %4374 = vtanh.f32 %v1281_v23  ;;  %v4008_v7 = vld [vmem:[%s5891_s3 + $0x3d8] ss:$12 sps:$4 sm:$0xff]   ;;  %v4012_v5 = vld [vmem:[%s5891_s3 + $0x3f0] ss:$12 sps:$4 sm:$0xff]   ;;  %v3999_v23 = vld [vmem:[%s5891_s3 + $0x4e8] ss:$12 sps:$4 sm:$0xff]  }
 0x22b   : > { %v4359_v30 = vpop.eup %4358  ;;  %v1267_v46 = vmul.f32 %v4357_v3, %v4355_v29  ;;  %3556 = vmatpush3.bf16.msra.mxu1 %v3959_v50  ;;  %2617 = vmatprep.mubr.bf16.mxu0 %v5437_v17  ;;  %v4017_v50 = vld [vmem:[%s5891_s3 + $0x40c] ss:$12 sps:$4 sm:$0xff]   ;;  %v4023_v3 = vld [vmem:[%s5891_s3 + $0x43c] ss:$12 sps:$4 sm:$0xff]  }
 0x22c   : > { %v4361_v1 = vpop.eup %4360  ;;  %3557 = vmatprep.subr.bf16.mxu1 %v3963_v19  ;;  %2591 = vmatprep.subr.bf16.mxu0 %v3986_v55  ;;  %v4015_v19 = vld [vmem:[%s5891_s3 + $0x408] ss:$12 sps:$4 sm:$0xff]   ;;  %v4020_v55 = vld [vmem:[%s5891_s3 + $0x424] ss:$12 sps:$4 sm:$0xff]   ;;  %v4003_v29 = vld [vmem:[%s5891_s3 + $0x500] ss:$12 sps:$4 sm:$0xff]  }
 0x22d   : > { %v4363_v36 = vpop.eup %4362  ;;  %v1288_v58 = vmul.f32 %v4361_v1, %v4359_v30  ;;  %2592 = vmatpush1.bf16.msra.mxu0 %v3984_v18  ;;  %4376 = vtanh.f32 %v1267_v46  ;;  %v4018_v18 = vld [vmem:[%s5891_s3 + $0x420] ss:$12 sps:$4 sm:$0xff]   ;;  %v4021_v30 = vld [vmem:[%s5891_s3 + $0x438] ss:$12 sps:$4 sm:$0xff]   ;;  %v4024_v1 = vld [vmem:[%s5891_s3 + $0x450] ss:$12 sps:$4 sm:$0xff]  }
 0x22e   : > { %v4365_v35 = vpop.eup %4364  ;;  %v1197_v62 = vadd.f32 1.0, %v4363_v36  ;;  %2593 = vmatprep.subr.bf16.mxu0 %v3990_v37  ;;  %v4007_v37 = vld [vmem:[%s5891_s3 + $0x518] ss:$12 sps:$4 sm:$0xff]   ;;  %v4026_v46 = vld [vmem:[%s5891_s3 + $0x454] ss:$12 sps:$4 sm:$0xff]  }
 0x22f   : > { %v4367_v8 = vpop.eup %4366  ;;  %4378 = vtanh.f32 %v1288_v58  ;;  %v1183_v54 = vadd.f32 1.0, %v4365_v35  ;;  %3558 = vmatpush3.bf16.msra.mxu1 %v3964_v13  ;;  %v4011_v13 = vld [vmem:[%s5891_s3 + $0x530] ss:$12 sps:$4 sm:$0xff]   ;;  %v4027_v36 = vld [vmem:[%s5891_s3 + $0x468] ss:$12 sps:$4 sm:$0xff]  }
 0x230   : > { %v4369_v26 = vpop.eup %4368  ;;  %4380 = vrcp.f32 %v1197_v62  ;;  %v1204_v17 = vadd.f32 1.0, %v4367_v8  ;;  %3559 = vmatprep.subr.bf16.mxu1 %v3968_v38  ;;  %v4029_v38 = vld [vmem:[%s5891_s3 + $0x46c] ss:$12 sps:$4 sm:$0xff]   ;;  %v4032_v58 = vld [vmem:[%s5891_s3 + $0x484] ss:$12 sps:$4 sm:$0xff]  }
 0x231   : > { %v4371_v11 = vpop.eup %4370  ;;  %4382 = vrcp.f32 %v1183_v54  ;;  %v1190_v25 = vadd.f32 1.0, %v4369_v26  ;;  %2594 = vmatpush1.bf16.msra.mxu0 %v3988_v10  ;;  %v4030_v10 = vld [vmem:[%s5891_s3 + $0x480] ss:$12 sps:$4 sm:$0xff]   ;;  %v4035_v35 = vld [vmem:[%s5891_s3 + $0x49c] ss:$12 sps:$4 sm:$0xff]   ;;  %v5922_v54 = vmov 0  }
 0x232   : > { %v4373_v63 = vpop.eup %4372  ;;  %4384 = vrcp.f32 %v1204_v17  ;;  %2595 = vmatprep.subr.bf16.mxu0 %v3994_v49  ;;  %v4033_v62 = vld [vmem:[%s5891_s3 + $0x498] ss:$12 sps:$4 sm:$0xff]   ;;  %v4038_v49 = vld [vmem:[%s5891_s3 + $0x4b4] ss:$12 sps:$4 sm:$0xff]   ;;  %v4036_v8 = vld [vmem:[%s5891_s3 + $0x4b0] ss:$12 sps:$4 sm:$0xff]  }
 0x233   : > { %v1274_v0 = vmul.f32 %v4373_v63, %v4371_v11  ;;  %4386 = vrcp.f32 %v1190_v25  ;;  %3560 = vmatpush3.bf16.msra.mxu1 %v3969_v53  ;;  %v4044_v53 = vld [vmem:[%s5891_s3 + $0x4e4] ss:$12 sps:$4 sm:$0xff]   ;;  %v4042_v26 = vld [vmem:[%s5891_s3 + $0x4e0] ss:$12 sps:$4 sm:$0xff]  }
 0x234   : > { %3561 = vmatprep.subr.bf16.mxu1 %v3973_v56  ;;  %v4375_v28 = vpop.eup %4374  ;;  %v4045_v17 = vld [vmem:[%s5891_s3 + $0x4f8] ss:$12 sps:$4 sm:$0xff]   ;;  %v4050_v56 = vld [vmem:[%s5891_s3 + $0x514] ss:$12 sps:$4 sm:$0xff]   ;;  %v4048_v11 = vld [vmem:[%s5891_s3 + $0x510] ss:$12 sps:$4 sm:$0xff]  }
 0x235   : > { %4388 = vtanh.f32 %v1274_v0  ;;  %2596 = vmatpush1.bf16.msra.mxu0 %v3992_v14  ;;  %v4053_v25 = vld [vmem:[%s5891_s3 + $0x52c] ss:$12 sps:$4 sm:$0xff]   ;;  %v4051_v14 = vld [vmem:[%s5891_s3 + $0x528] ss:$12 sps:$4 sm:$0xff]  }
 0x236   : > { %2597 = vmatprep.subr.bf16.mxu0 %v3998_v45 }
 0x237   : > { %3562 = vmatpush3.bf16.msra.mxu1 %v3974_v21  ;;  %v4377_v47 = vpop.eup %4376 }
 0x238   : > { %3563 = vmatprep.subr.bf16.mxu1 %v3978_v9 }
 0x239   : > { %v4379_v31 = vpop.eup %4378  ;;  %2598 = vmatpush1.bf16.msra.mxu0 %v3996_v57 }
 0x23a   : > { %v4381_v43 = vpop.eup %4380  ;;  %2599 = vmatprep.subr.bf16.mxu0 %v4002_v24 }
 0x23b   : > { %v4383_v52 = vpop.eup %4382  ;;  %3564 = vmatpush3.bf16.msra.mxu1 %v3979_v6  ;;  %v1337_v48 = vmul.f32 %v4381_v43, %v4375_v28  ;;  %v2928_v43 = vld [vmem:[%s5893_s5 + $0x88] sm:$0xff] }
 0x23c   : > { %v4385_v22 = vpop.eup %4384  ;;  %3657 = vmatprep.subr.bf16.mxu1 %v3983_v20  ;;  %v1323_v32 = vmul.f32 %v4383_v52, %v4377_v47 }
 0x23d   : > { %v4387_v42 = vpop.eup %4386  ;;  %2600 = vmatpush1.bf16.msra.mxu0 %v4000_v4  ;;  %v1344_v34 = vmul.f32 %v4385_v22, %v4379_v31  ;;  %v2927_v4 = vld [vmem:[%s5893_s5 + $0x80] sm:$0xff]  ;;  %v2929_v22 = vld [vmem:[%s5893_s5 + $0x90] sm:$0xff] }
 0x23e   : > { %2822 = vmatmul.mubr.bf16.vlgmr.msra.gmra.mrb[64].mxu1 %v5407_v15  ;;  %2601 = vmatprep.subr.bf16.mxu0 %v4006_v61  ;;  %v2911_v61 = vld [vmem:[%s5893_s5] sm:$0xff]  ;;  %v3699_v52 = vpack.c.bf16 %v2928_v43, %v2927_v4 }
 0x23f   : > { %v4389_v39 = vpop.eup %4388  ;;  %2829 = vmatprep.mubr.bf16.mxu1 %v5476_v60  ;;  %3658 = vmatpush3.bf16.msra.mxu1 %v3983_v20  ;;  %v5551_v41 = vpack.c.bf16 %v1344_v34, %v1337_v48  ;;  %v2912_v48 = vld [vmem:[%s5893_s5 + $0x8] sm:$0xff]  ;;  %v2914_v34 = vld [vmem:[%s5893_s5 + $0x18] sm:$0xff] }
 0x240   : > { %3659 = vmatprep.subr.bf16.mxu1 %v3987_v2  ;;  %v1330_v33 = vmul.f32 %v4389_v39, %v4387_v42  ;;  %v2932_v39 = vld [vmem:[%s5893_s5 + $0xa8] sm:$0xff] }
 0x241   : > { %2602 = vmatpush1.bf16.msra.mxu0 %v4004_v59  ;;  %v2913_v59 = vld [vmem:[%s5893_s5 + $0x10] sm:$0xff] }
 0x242   : > { %v5559_v16 = vpack.c.bf16 %v1330_v33, %v1323_v32  ;;  %2603 = vmatprep.subr.bf16.mxu0 %v4010_v27  ;;  %v3701_v32 = vpack.c.bf16 %v2912_v48, %v2911_v61  ;;  %v2931_v27 = vld [vmem:[%s5893_s5 + $0xa0] sm:$0xff] }
 0x243   : > { %3660 = vmatpush3.bf16.msra.mxu1 %v3987_v2  ;;  %v2930_v2 = vld [vmem:[%s5893_s5 + $0x98] sm:$0xff]  ;;  %v2915_v33 = vld [vmem:[%s5893_s5 + $0x20] sm:$0xff] }
 0x244   : > { %3661 = vmatprep.subr.bf16.mxu1 %v3991_v44  ;;  %v3703_v42 = vpack.c.bf16 %v2930_v2, %v2929_v22 }
 0x245   : > { %2604 = vmatpush1.bf16.msra.mxu0 %v4008_v7  ;;  %v2916_v7 = vld [vmem:[%s5893_s5 + $0x28] sm:$0xff] }
 0x246   : > { %2830 = vmatmul.mubr.bf16.gmra.mrb[68].mxu1 %v5471_v40  ;;  %2605 = vmatprep.subr.bf16.mxu0 %v4014_v12  ;;  %v2934_v12 = vld [vmem:[%s5893_s5 + $0xb8] sm:$0xff] }
 0x247   : > { %3662 = vmatpush3.bf16.msra.mxu1 %v3991_v44  ;;  %3673 = vmatprep.mubr.bf16.mxu1 %v5559_v16  ;;  %v3707_v44 = vpack.c.bf16 %v2932_v39, %v2931_v27 }
 0x248   : > { %3663 = vmatprep.subr.bf16.mxu1 %v3995_v51 }
 0x249   : > { %2606 = vmatpush1.bf16.msra.mxu0 %v4012_v5 }
 0x24a   : > { %2607 = vmatprep.subr.bf16.mxu0 %v4017_v50  ;;  %v2917_v50 = vld [vmem:[%s5893_s5 + $0x30] sm:$0xff] }
 0x24b   : > { %3664 = vmatpush3.bf16.msra.mxu1 %v3995_v51  ;;  %v3709_v51 = vpack.c.bf16 %v2916_v7, %v2915_v33 }
 0x24c   : > { %3665 = vmatprep.subr.bf16.mxu1 %v3999_v23 }
 0x24d   : > { %2608 = vmatpush1.bf16.msra.mxu0 %v4015_v19  ;;  %v2935_v19 = vld [vmem:[%s5893_s5 + $0xc0] sm:$0xff] }
 0x24e   : > { %2609 = vmatprep.subr.bf16.mxu0 %v4020_v55  ;;  %v2936_v55 = vld [vmem:[%s5893_s5 + $0xc8] sm:$0xff] }
 0x24f   : > { %3666 = vmatpush3.bf16.msra.mxu1 %v3999_v23  ;;  %v2918_v23 = vld [vmem:[%s5893_s5 + $0x38] sm:$0xff] }
 0x250   : > { %3667 = vmatprep.subr.bf16.mxu1 %v4003_v29 }
 0x251   : > { %2610 = vmatpush1.bf16.msra.mxu0 %v4018_v18  ;;  %v3715_v18 = vpack.c.bf16 %v2936_v55, %v2935_v19 }
 0x252   : > { %2611 = vmatprep.subr.bf16.mxu0 %v4023_v3  ;;  %v2919_v3 = vld [vmem:[%s5893_s5 + $0x40] sm:$0xff] }
 0x253   : > { %3668 = vmatpush3.bf16.msra.mxu1 %v4003_v29  ;;  %v3713_v29 = vpack.c.bf16 %v2918_v23, %v2917_v50 }
 0x254   : > { %3669 = vmatprep.subr.bf16.mxu1 %v4007_v37 }
 0x255   : > { %2612 = vmatpush1.bf16.msra.mxu0 %v4021_v30  ;;  %v2937_v30 = vld [vmem:[%s5893_s5 + $0xd0] sm:$0xff] }
 0x256   : > { %2613 = vmatprep.subr.bf16.mxu0 %v4026_v46  ;;  %v2938_v46 = vld [vmem:[%s5893_s5 + $0xd8] sm:$0xff] }
 0x257   : > { %3670 = vmatpush3.bf16.msra.mxu1 %v4007_v37  ;;  %v2920_v37 = vld [vmem:[%s5893_s5 + $0x48] sm:$0xff] }
 0x258   : > { %3671 = vmatprep.subr.bf16.mxu1 %v4011_v13 }
 0x259   : > { %2614 = vmatpush1.bf16.msra.mxu0 %v4024_v1  ;;  %v3719_v1 = vpack.c.bf16 %v2938_v46, %v2937_v30  ;;  %v2887_v30 = vld [vmem:[%s5892_s4] sm:$0xff]  ;;  %v2945_v46 = vld [vmem:[%s5893_s5 + $0x110] sm:$0xff] }
 0x25a   : > { %2615 = vmatprep.subr.bf16.mxu0 %v4029_v38  ;;  %v2921_v38 = vld [vmem:[%s5893_s5 + $0x50] sm:$0xff] }
 0x25b   : > { %3672 = vmatpush3.bf16.msra.mxu1 %v4011_v13  ;;  %v3717_v13 = vpack.c.bf16 %v2920_v37, %v2919_v3  ;;  %v2888_v3 = vld [vmem:[%s5892_s4 + $0x8] sm:$0xff] }
 0x25c   : > { %3700 = vmatprep.subr.bf16.mxu1 %v3699_v52 }
 0x25d   : > { %2616 = vmatpush1.bf16.msra.mxu0 %v4027_v36  ;;  %v2922_v36 = vld [vmem:[%s5893_s5 + $0x58] sm:$0xff] }
 0x25e   : > { %3674 = vmatmul.mubr.bf16.vlgmr.msra.gmra.mrb[72].mxu1 %v5551_v41  ;;  %2638 = vmatprep.subr.bf16.mxu0 %v4032_v58  ;;  %v2939_v58 = vld [vmem:[%s5893_s5 + $0xe0] sm:$0xff] }
 0x25f   : > { %3702 = vmatpush3.bf16.msra.mxu1 %v3701_v32 }
 0x260   : > { %2618 = vmatmul.mubr.bf16.vlgmr.msra.gmra.mrb[36].mxu0 %v5407_v15  ;;  %v4041_v15 = vld [vmem:[%s5891_s3 + $0x4cc] ss:$12 sps:$4 sm:$0xff]   ;;  %3704 = vmatprep.subr.bf16.mxu1 %v3703_v42 }
 0x261   : > { %2627 = vmatprep.mubr.bf16.mxu0 %v5476_v60  ;;  %2639 = vmatpush1.bf16.msra.mxu0 %v4030_v10  ;;  %v4039_v60 = vld [vmem:[%s5891_s3 + $0x4c8] ss:$12 sps:$4 sm:$0xff]  }
 0x262   : > { %2640 = vmatprep.subr.bf16.mxu0 %v4035_v35  ;;  %v2940_v10 = vld [vmem:[%s5893_s5 + $0xe8] sm:$0xff]  ;;  %v3721_v35 = vpack.c.bf16 %v2922_v36, %v2921_v38  ;;  %v2891_v38 = vld [vmem:[%s5892_s4 + $0x20] sm:$0xff] }
 0x265   : > { %2641 = vmatpush1.bf16.msra.mxu0 %v4033_v62  ;;  %v3723_v62 = vpack.c.bf16 %v2940_v10, %v2939_v58 }
 0x266   : > { %2642 = vmatprep.subr.bf16.mxu0 %v4038_v49  ;;  %v2923_v49 = vld [vmem:[%s5893_s5 + $0x60] sm:$0xff] }
 0x268   : > { %2628 = vmatmul.mubr.bf16.gmra.mrb[40].mxu0 %v5471_v40  ;;  %v4047_v40 = vld [vmem:[%s5891_s3 + $0x4fc] ss:$12 sps:$4 sm:$0xff]  }
 0x269   : > { %2643 = vmatpush1.bf16.msra.mxu0 %v4036_v8  ;;  %2670 = vmatprep.mubr.bf16.mxu0 %v5922_v54  ;;  %v2924_v8 = vld [vmem:[%s5893_s5 + $0x68] sm:$0xff] }
 0x26a   : > { %2644 = vmatprep.subr.bf16.mxu0 %v4041_v15  ;;  %v3725_v15 = vpack.c.bf16 %v2924_v8, %v2923_v49  ;;  %v2890_v49 = vld [vmem:[%s5892_s4 + $0x18] sm:$0xff] }
 0x26d   : > { %2645 = vmatpush1.bf16.msra.mxu0 %v4039_v60  ;;  %v2941_v60 = vld [vmem:[%s5893_s5 + $0xf0] sm:$0xff] }
 0x26e   : > { %2646 = vmatprep.subr.bf16.mxu0 %v4044_v53 }
 0x271   : > { %2647 = vmatpush1.bf16.msra.mxu0 %v4042_v26  ;;  %v2925_v26 = vld [vmem:[%s5893_s5 + $0x70] sm:$0xff] }
 0x272   : > { %2648 = vmatprep.subr.bf16.mxu0 %v4047_v40  ;;  %v2926_v40 = vld [vmem:[%s5893_s5 + $0x78] sm:$0xff] }
 0x275   : > { %2649 = vmatpush1.bf16.msra.mxu0 %v4045_v17  ;;  %v3729_v17 = vpack.c.bf16 %v2926_v40, %v2925_v26 }
 0x276   : > { %2650 = vmatprep.subr.bf16.mxu0 %v4050_v56  ;;  %v2943_v56 = vld [vmem:[%s5893_s5 + $0x100] sm:$0xff] }
 0x279   : > { %2651 = vmatpush1.bf16.msra.mxu0 %v4048_v11  ;;  %v2944_v11 = vld [vmem:[%s5893_s5 + $0x108] sm:$0xff] }
 0x27a   : > { %2652 = vmatprep.subr.bf16.mxu0 %v4053_v25  ;;  %v3731_v25 = vpack.c.bf16 %v2944_v11, %v2943_v56  ;;  %v2949_v56 = vld [vmem:[%s5893_s5 + $0x130] sm:$0xff]  ;;  %v2950_v11 = vld [vmem:[%s5893_s5 + $0x138] sm:$0xff] }
 0x27d   : > { %2653 = vmatpush1.bf16.msra.mxu0 %v4051_v14 }
 0x280   : > { %2671 = vmatmul.mubr.bf16.vlgmr.msra.gmra.mrb[36].mxu0 %v5559_v16  ;;  %v2933_v16 = vld [vmem:[%s5893_s5 + $0xb0] sm:$0xff] }
 0x281   : > { %2680 = vmatprep.mubr.bf16.mxu0 %v5922_v54  ;;  %v3711_v5 = vpack.c.bf16 %v2934_v12, %v2933_v16  ;;  %v2942_v54 = vld [vmem:[%s5893_s5 + $0xf8] sm:$0xff] }
 0x282   : > { %v3727_v53 = vpack.c.bf16 %v2942_v54, %v2941_v60  ;;  %v2948_v60 = vld [vmem:[%s5893_s5 + $0x128] sm:$0xff] }
 0x288   : > { %2681 = vmatmul.mubr.bf16.gmra.mrb[40].mxu0 %v5551_v41  ;;  %v3705_v41 = vpack.c.bf16 %v2914_v34, %v2913_v59 }
 0x28a   : > { %3706 = vmatpush3.bf16.msra.mxu1 %v3705_v41 }
 0x28b   : > { %3708 = vmatprep.subr.bf16.mxu1 %v3707_v44 }
 0x28e   : > { %3710 = vmatpush3.bf16.msra.mxu1 %v3709_v51 }
 0x28f   : > { %3712 = vmatprep.subr.bf16.mxu1 %v3711_v5 }
 0x292   : > { %3714 = vmatpush3.bf16.msra.mxu1 %v3713_v29 }
 0x293   : > { %3716 = vmatprep.subr.bf16.mxu1 %v3715_v18 }
 0x296   : > { %3718 = vmatpush3.bf16.msra.mxu1 %v3717_v13  ;;  %v2946_v13 = vld [vmem:[%s5893_s5 + $0x118] sm:$0xff] }
 0x297   : > { %3720 = vmatprep.subr.bf16.mxu1 %v3719_v1 }
 0x29a   : > { %3722 = vmatpush3.bf16.msra.mxu1 %v3721_v35 }
 0x29b   : > { %3724 = vmatprep.subr.bf16.mxu1 %v3723_v62  ;;  %v3735_v62 = vpack.c.bf16 %v2946_v13, %v2945_v46 }
 0x29d   : > { %v3509_v63 = vpop.f32.mrb[48].mxu1 }
 0x29e   : > { %v3510_v45 = vpop.f32.mrb[49].mxu1  ;;  %3726 = vmatpush3.bf16.msra.mxu1 %v3725_v15  ;;  %v2947_v15 = vld [vmem:[%s5893_s5 + $0x120] sm:$0xff] }
 0x29f   : > { %v5670_v0 = vadd.f32 %v3510_v45, %v3509_v63  ;;  %v3512_v21 = vpop.f32.mrb[50].mxu1  ;;  %3728 = vmatprep.subr.bf16.mxu1 %v3727_v53  ;;  %v2894_v53 = vld [vmem:[%s5892_s4 + $0x38] sm:$0xff]  ;;  %v3739_v26 = vpack.c.bf16 %v2948_v60, %v2947_v15 }
 0x2a0   : > { %v3513_v9 = vpop.f32.mrb[51].mxu1 }
 0x2a1   : > { %v5672_v57 = vadd.f32 %v3513_v9, %v3512_v21 }
 0x2a2   : > { %3730 = vmatpush3.bf16.msra.mxu1 %v3729_v17  ;;  %v2893_v17 = vld [vmem:[%s5892_s4 + $0x30] sm:$0xff] }
 0x2a3   : > { %3732 = vmatprep.subr.bf16.mxu1 %v3731_v25 }
 0x2a5   : > { %v3515_v24 = vpop.f32.mrb[52].mxu1 }
 0x2a6   : > { %v3516_v28 = vpop.f32.mrb[53].mxu1 }
 0x2a7   : > { %v5674_v6 = vadd.f32 %v3516_v28, %v3515_v24  ;;  %v3518_v47 = vpop.f32.mrb[54].mxu1 }
 0x2a8   : > { %v3519_v20 = vpop.f32.mrb[55].mxu1 }
 0x2a9   : > { %v5676_v31 = vadd.f32 %v3519_v20, %v3518_v47 }
 0x2f1   : > { %v3537_v14 = vpop.f32.mrb[56].mxu1 }
 0x2f2   : > { %v3538_v63 = vpop.f32.mrb[57].mxu1 }
 0x2f3   : > { %v3539_v45 = vadd.f32 %v3538_v63, %v3537_v14  ;;  %v3540_v21 = vpop.f32.mrb[58].mxu1  ;;  %v2897_v14 = vld [vmem:[%s5892_s4 + $0x50] sm:$0xff] }
 0x2f4   : > { %v3541_v9 = vpop.f32.mrb[59].mxu1 }
 0x2f5   : > { %v2775_v24 = vadd.f32 %v3539_v45, %v5670_v0  ;;  %v3542_v28 = vadd.f32 %v3541_v9, %v3540_v21 }
 0x2f7   : > { %v2778_v47 = vadd.f32 %v3542_v28, %v5672_v57  ;;  %v2896_v28 = vld [vmem:[%s5892_s4 + $0x48] sm:$0xff] }
 0x2fc   : > { %v3543_v20 = vpop.f32.mrb[60].mxu1 }
 0x2fd   : > { %v3544_v4 = vpop.f32.mrb[61].mxu1 }
 0x2fe   : > { %v3545_v43 = vadd.f32 %v3544_v4, %v3543_v20  ;;  %v3546_v61 = vpop.f32.mrb[62].mxu1  ;;  %v2889_v20 = vld [vmem:[%s5892_s4 + $0x10] sm:$0xff] }
 0x2ff   : > { %v3547_v52 = vpop.f32.mrb[63].mxu1 }
 0x300   : > { %v2783_v48 = vadd.f32 %v3545_v43, %v5674_v6  ;;  %v3548_v22 = vadd.f32 %v3547_v52, %v3546_v61  ;;  %v2892_v61 = vld [vmem:[%s5892_s4 + $0x28] sm:$0xff]  ;;  %v2895_v52 = vld [vmem:[%s5892_s4 + $0x40] sm:$0xff] }
 0x302   : > { %v2786_v2 = vadd.f32 %v3548_v22, %v5676_v31 }
 0x311   : > { %v3565_v32 = vpop.f32.mrb[64].mxu1 }
 0x312   : > { %v3566_v42 = vpop.f32.mrb[65].mxu1 }
 0x313   : > { %v3567_v59 = vadd.f32 %v3566_v42, %v3565_v32  ;;  %v3568_v34 = vpop.f32.mrb[66].mxu1 }
 0x314   : > { %v3569_v27 = vpop.f32.mrb[67].mxu1 }
 0x315   : > { %v3570_v39 = vadd.f32 %v3569_v27, %v3568_v34  ;;  %v2824_v0 = vadd.f32 %v3567_v59, %v2775_v24  ;;  %v3743_v24 = vpack.c.bf16 %v2950_v11, %v2949_v56 }
 0x317   : > { %v2827_v41 = vadd.f32 %v3570_v39, %v2778_v47 }
 0x319   : > { %v3571_v44 = vpop.f32.mrb[68].mxu1 }
 0x31a   : > { %v3572_v57 = vpop.f32.mrb[69].mxu1 }
 0x31b   : > { %v3573_v33 = vadd.f32 %v3572_v57, %v3571_v44  ;;  %v3574_v7 = vpop.f32.mrb[70].mxu1 }
 0x31c   : > { %v3575_v16 = vpop.f32.mrb[71].mxu1 }
 0x31d   : > { %v3576_v12 = vadd.f32 %v3575_v16, %v3574_v7  ;;  %v2832_v51 = vadd.f32 %v3573_v33, %v2783_v48 }
 0x31f   : > { %v2835_v5 = vadd.f32 %v3576_v12, %v2786_v2  ;;  %v2898_v2 = vld [vmem:[%s5892_s4 + $0x58] sm:$0xff] }
 0x331   : > { %v3675_v6 = vpop.f32.mrb[72].mxu1 }
 0x332   : > { %v2881_v50 = vadd.f32 %v3675_v6, %v2832_v51  ;;  %v2872_v23 = vpop.f32.mrb[73].mxu1 }
 0x333   : > { %v2873_v31 = vadd.f32 %v2872_v23, %v2824_v0  ;;  %v3676_v19 = vpop.f32.mrb[74].mxu1 }
 0x334   : > { %v2884_v55 = vadd.f32 %v3676_v19, %v2835_v5  ;;  %v2875_v29 = vpop.f32.mrb[75].mxu1  ;;  %v2907_v22 = vmul.f32 %v2895_v52, %v2881_v50 }
 0x335   : > { %v2876_v18 = vadd.f32 %v2875_v29, %v2827_v41  ;;  %v2901_v43 = vmul.f32 %v2889_v20, %v2873_v31 }
 0x336   : > { %v2910_v32 = vmul.f32 %v2898_v2, %v2884_v55 }
 0x337   : > { %v2904_v48 = vmul.f32 %v2892_v61, %v2876_v18 }
 0x353   : > { %v2672_v37 = vpop.f32.mrb[36].mxu0 }
 0x354   : > { %v2674_v1 = vpop.f32.mrb[37].mxu0  ;;  %v2899_v10 = vmul.f32 %v2887_v30, %v2672_v37 }
 0x355   : > { %v2900_v36 = vmul.f32 %v2888_v3, %v2674_v1  ;;  %v2676_v58 = vpop.f32.mrb[38].mxu0 }
 0x356   : > { %v2678_v35 = vpop.f32.mrb[39].mxu0  ;;  %v2902_v54 = vmul.f32 %v2890_v49, %v2676_v58 }
 0x357   : > { %v2903_v8 = vmul.f32 %v2891_v38, %v2678_v35  ;;  %3028 = vmatprep.mubr.f32.mxu1 %v2900_v36 }
 0x358   : > { %3029 = vmatmul.mubr.f32.vlgmr.msra.gmra.mrb[76].mxu1 %v2899_v10  ;;  %v3148_v10 = vld [vmem:[%s5894_s6] sm:$0x1] }
 0x359   : > { %3734 = vmatpush3.bf16.msra.mxu1 %v3731_v25  ;;  %3033 = vmatprep.mubr.f32.mxu1 %v2903_v8 }
 0x35a   : > { %3736 = vmatprep.subr.bf16.mxu1 %v3735_v62 }
 0x35b   : > { %v2682_v40 = vpop.f32.mrb[40].mxu0 }
 0x35c   : > { %v2684_v25 = vpop.f32.mrb[41].mxu0  ;;  %3034 = vmatmul.mubr.f32.gmra.mrb[78].mxu1 %v2902_v54  ;;  %v2905_v21 = vmul.f32 %v2893_v17, %v2682_v40 }
 0x35d   : > { %v2906_v63 = vmul.f32 %v2894_v53, %v2684_v25  ;;  %3738 = vmatpush3.bf16.msra.mxu1 %v3735_v62  ;;  %v2686_v45 = vpop.f32.mrb[42].mxu0 }
 0x35e   : > { %v2688_v9 = vpop.f32.mrb[43].mxu0  ;;  %3740 = vmatprep.subr.bf16.mxu1 %v3739_v26  ;;  %v2908_v4 = vmul.f32 %v2896_v28, %v2686_v45 }
 0x35f   : > { %v2909_v47 = vmul.f32 %v2897_v14, %v2688_v9  ;;  %3038 = vmatprep.mubr.f32.mxu1 %v2906_v63 }
 0x360   : > { %3039 = vmatmul.mubr.f32.gmra.mrb[80].mxu1 %v2905_v21 }
 0x361   : > { %3742 = vmatpush3.bf16.msra.mxu1 %v3739_v26  ;;  %3043 = vmatprep.mubr.f32.mxu1 %v2909_v47 }
 0x362   : > { %3744 = vmatprep.subr.bf16.mxu1 %v3743_v24 }
 0x364   : > { %3044 = vmatmul.mubr.f32.gmra.mrb[82].mxu1 %v2908_v4 }
 0x365   : > { %3746 = vmatpush3.bf16.msra.mxu1 %v3743_v24  ;;  %3693 = vmatprep.mubr.msk.f32.mxu1 %vm2951_vm10, %v2901_v43 }
 0x368   : > { %3694 = vmatmul.mubr.msk.f32.vlgmr.msra.gmra.mrb[84].mxu1 %vm2951_vm10, %v2904_v48 }
 0x369   : > { %3696 = vmatprep.mubr.msk.f32.mxu1 %vm2951_vm10, %v2907_v22 }
 0x36c   : > { %3697 = vmatmul.mubr.msk.f32.gmra.mrb[86].mxu1 %vm2951_vm10, %v2910_v32 }
 0x42b   : > { %v3619_v42 = vpop.f32.mrb[76].mxu1 }
 0x42c   : > { %v3620_v59 = vpop.f32.mrb[77].mxu1 }
 0x42d   : > { %v3621_v34 = vadd.f32 %v3620_v59, %v3619_v42 }
 0x42f   : > { %v3622_v27 = vpop.f32.mrb[78].mxu1 }
 0x430   : > { %v3623_v39 = vpop.f32.mrb[79].mxu1 }
 0x431   : > { %v3624_v0 = vadd.f32 %v3623_v39, %v3622_v27 }
 0x433   : > { %v3625_v41 = vpop.f32.mrb[80].mxu1 }
 0x434   : > { %v3626_v44 = vpop.f32.mrb[81].mxu1 }
 0x435   : > { %v3627_v57 = vadd.f32 %v3626_v44, %v3625_v41 }
 0x437   : > { %v3628_v33 = vpop.f32.mrb[82].mxu1 }
 0x438   : > { %v3629_v7 = vpop.f32.mrb[83].mxu1 }
 0x439   : > { %v3630_v16 = vadd.f32 %v3629_v7, %v3628_v33 }
 0x43b   : > { %v3695_v12 = vpop.f32.mrb[84].mxu1 }
 0x43c   : > { %v3121_v51 = vadd.f32 %v3695_v12, %v3624_v0  ;;  %v3115_v5 = vpop.f32.mrb[85].mxu1 }
 0x43d   : > { %v3116_v6 = vadd.f32 %v3621_v34, %v3115_v5 }
 0x43e   : > { %v3136_v50 = vsel %vm3134_vm11, %v3121_v51, 0.0 }
 0x43f   : > { %v3135_v23 = vsel %vm3134_vm11, %v3116_v6, 0.0  ;;  %v3698_v31 = vpop.f32.mrb[86].mxu1 }
 0x440   : > { %v3137_v19 = vadd.f32 %v3136_v50, %v3135_v23  ;;  %v3131_v55 = vadd.f32 %v3698_v31, %v3630_v16  ;;  %v3125_v29 = vpop.f32.mrb[87].mxu1 }
 0x441   : > { %v3126_v18 = vadd.f32 %v3627_v57, %v3125_v29 }
 0x442   : > { %v3140_v30 = vsel %vm3134_vm11, %v3131_v55, 0.0 }
 0x443   : > { %v3138_v3 = vsel %vm3134_vm11, %v3126_v18, 0.0 }
 0x444   : > { %v3139_v37 = vadd.f32 %v3138_v3, %v3137_v19 }
 0x446   : > { %v3141_v46 = vadd.f32 %v3140_v30, %v3139_v37 }
 0x448   : > { %v3142_v13 = vrot.slane %v3141_v46, 4 }
 0x44a   : > { %v3143_v1 = vadd.f32 %v3142_v13, %v3141_v46 }
 0x44c   : > { %v3144_v38 = vrot.slane %v3143_v1, 2 }
 0x44e   : > { %v3145_v36 = vadd.f32 %v3144_v38, %v3143_v1 }
 0x450   : > { %v3146_v58 = vrot.slane %v3145_v36, 1 }
 0x452   : > { %v3147_v35 = vadd.f32 %v3146_v58, %v3145_v36 }
 0x454   : > { %v3149_v62 = vadd.f32 %v3148_v10, %v3147_v35 }
 0x456   : > { %3151 = vst.msk [vmem:[%s268_s16] sm:$0x1] %vm3150_vm12, %v3149_v62 }
 0x457   : > { %4403 = shalt.err (!%p4400_p3)
}
 0x458   : > { %s4404_s8 = scalar_lea.hbm %s5846_s20, 16  ;;  %s4408_s14 = scalar_lea.hbm %s5895_s7, 32 }
 0x459   : > { %p4405_p4 = scmp.ne.s32.totalorder %s5846_s20, %s4404_s8  ;;  %p4409_p9 = scmp.lt.u32.totalorder %s5846_s20, %s5895_s7 }
 0x45a   : > { %p4410_p10 = scmp.lt.u32.totalorder %s4408_s14, %s4404_s8  ;;  %p4412_p12 = scmp.lt.u32.totalorder %s4404_s8, %s5846_s20 }
 0x45b   : > { %p4406_p7 = pnand %p4405_p4, %p4543_p5 }
 0x45c   : > { %p4411_p11 = por %p4410_p10, %p4409_p9 }
 0x45d   : > { %p4407_p8 = pneg %p4406_p7 }
 0x45e   : > { %p4413_p13 = por %p4412_p12, %p4411_p11 }
 0x460   : > { %p4414_p0 = pnand %p4413_p13, %p4407_p8 }
 0x462   : > { %4417 = shalt.err (!%p4414_p0)
}
 0x463   : > { %3773 = dma.vmem_to_hbm [thread:$0]  (%p4543_p5), %s5848_s17, 16, %s5846_s20, %s3153_s21  }
 0x464 PF: > { %p3779_p1 = scmp.ge.s32.totalorder %s4452_s27, 2  ;;  %s3177_s18 = sand.u32 1, %s4440_s24  }
 0x465   : > { %s3178_s19 = scalar_lea.sflag [#allocation4], %s3177_s18 }
 0x466   : > { %p3776_p2 = pnand %p3779_p1, %p4547_p6 }
 0x468   : > { %4435 = dma.done.wait (!%p3776_p2), %s3178_s19, 16  }
 0x469   : > { %4437 = vsyncadd (!%p3776_p2), %s3178_s19, 4294967280  ;;  %p17_p3 = scmp.ge.s32.totalorder %s4530_s30, 4   ;;  %s5923_s24 = smov %s4444_s25 }
 0x46a   : > { %s5924_s25 = smov %s4448_s26  ;;  %s5925_s26 = smov %s4541_s10 }
 0x46b   : > { %s5926_s27 = smov %s4530_s30  ;;  %19 = sbr.rel (!%p17_p3) target bundleno = 3 (0x3), region = 91 }
 0x472   :  { %3182 = vsyncpa [#allocation4], 1 }
 0x473   :  { %3184 = vsyncpa [#allocation4 + $0x1], 1 }

</bundles_post_ra>
